<compile_context>
chip_gen: v7x
topology: tpu7x:2x2x1
jax: 0.10.0
libtpu: 0.0.40
codegen_flags: <defaults>
</compile_context>

<pallas_src>
import functools

import jax
import jax.numpy as jnp
from jax.experimental import pallas as pl
from jax.experimental.pallas import tpu as pltpu

LANE = 128
EPS = 1e-5
_VMEM_LIMIT = 48 * 1024 * 1024     # < 64 MiB physical on v7x, above 16/32 MiB defaults
_XW_RESIDENT_BYTES = 16 * 1024 * 1024


def _round_up(v, m):
    return (v + m - 1) // m * m


def _choose_node_padding(n_real, target=512):
    """Pad N up to a multiple of the target tile (never shrink the tile to 128)."""
    base = _round_up(max(n_real, LANE), LANE)
    tile = min(target, base)
    n_pad = _round_up(base, tile)
    return n_pad, tile


# ---------------------------------------------------------------------------
# Kernel 1: feature transform  XW = [relu(GraphNorm(h))] @ W
#   - GraphNorm/ReLU of the *previous* layer fused here (hoisted out of the
#     aggregation k-loop); norm statistics arrive as reduced per-feature sums.
# ---------------------------------------------------------------------------
def _transform_kernel(*refs, n_real, apply_norm):
    if apply_norm:
        h_ref, w_ref, gamma_ref, beta_ref, alpha_ref, stats_ref, xw_ref = refs
    else:
        h_ref, w_ref, xw_ref = refs

    h = h_ref[...].astype(jnp.float32)               # (row_tile, F_pad)
    if apply_norm:
        inv_n = 1.0 / float(n_real)                  # multiply, not divide
        alpha = alpha_ref[...]
        mean = stats_ref[0:1, :] * inv_n             # E[h]
        mean_sq = stats_ref[1:2, :] * inv_n          # E[h^2]
        # var of (h - alpha*mean) = E[h^2] - (2a - a^2) * mean^2
        var = jnp.maximum(mean_sq - (2.0 * alpha - alpha * alpha) * mean * mean, 0.0)
        inv_std = jax.lax.rsqrt(var + EPS)           # EUP slot
        h = gamma_ref[...] * (h - alpha * mean) * inv_std + beta_ref[...]
        h = jnp.maximum(h, 0.0)                      # ReLU
        # TODO(synk): training-mode dropout would use pltpu.prng_random_bits here.

    xw = jnp.dot(h.astype(jnp.bfloat16), w_ref[...],
                 preferred_element_type=jnp.float32)
    xw_ref[...] = xw.astype(xw_ref.dtype)


def feature_transform(h, w_bf16, norm=None, stats=None, *, n_real, row_tile):
    n_pad, f_in_pad = h.shape
    f_out_pad = w_bf16.shape[1]
    apply_norm = norm is not None

    in_specs = [
        pl.BlockSpec((row_tile, f_in_pad), lambda i: (i, 0)),      # h row tile
        pl.BlockSpec((f_in_pad, f_out_pad), lambda i: (0, 0)),     # W (resident)
    ]
    args = [h, w_bf16]
    if apply_norm:
        gamma, beta, alpha = norm
        vec = pl.BlockSpec((1, f_in_pad), lambda i: (0, 0))
        in_specs += [vec, vec, vec,
                     pl.BlockSpec((8, f_in_pad), lambda i: (0, 0))]
        args += [gamma, beta, alpha, stats]

    kernel = functools.partial(_transform_kernel, n_real=n_real,
                               apply_norm=apply_norm)
    return pl.pallas_call(
        kernel,
        out_shape=jax.ShapeDtypeStruct((n_pad, f_out_pad), jnp.bfloat16),
        grid=(n_pad // row_tile,),
        in_specs=in_specs,
        out_specs=pl.BlockSpec((row_tile, f_out_pad), lambda i: (i, 0)),
        compiler_params=pltpu.CompilerParams(
            dimension_semantics=("parallel",),
            vmem_limit_bytes=_VMEM_LIMIT),
    )(*args)


# ---------------------------------------------------------------------------
# Kernel 2: aggregation  H = A_hat @ XW + b   (+ per-row-tile GraphNorm partials)
#   grid = (row tiles i, occupied-column-tile slots k); block-sparse A stream via
#   scalar-prefetched tile ids; f32 VMEM accumulator; bf16 streams.
# ---------------------------------------------------------------------------
def _aggregate_kernel(tids_ref, cnts_ref, a_ref, xw_ref, b_ref, *rest,
                      n_real, row_tile, k_tile, compute_stats, xw_resident):
    if compute_stats:
        h_ref, stats_ref, acc_ref = rest
    else:
        h_ref, acc_ref = rest

    i = pl.program_id(0)
    k = pl.program_id(1)

    @pl.when(k == 0)
    def _():
        acc_ref[...] = jnp.zeros_like(acc_ref)

    # Only occupied A tiles contribute; padded grid steps repeat the previous
    # block index (no re-DMA) and are skipped here.
    @pl.when(k < cnts_ref[i])
    def _():
        if xw_resident:
            tid = tids_ref[i, k]
            start = pl.multiple_of(tid * k_tile, k_tile)
            xw = xw_ref[pl.ds(start, k_tile), :]
        else:
            xw = xw_ref[...]
        acc_ref[...] += jnp.dot(a_ref[...], xw,
                                preferred_element_type=jnp.float32)

    @pl.when(k == pl.num_programs(1) - 1)
    def _():
        h = acc_ref[...] + b_ref[...]
        h_ref[...] = h.astype(h_ref.dtype)           # bf16 for intermediate layers
        if compute_stats:
            # per-row-tile partial sums, masked so padding rows do not pollute
            row = jax.lax.broadcasted_iota(jnp.int32, h.shape, 0) + i * row_tile
            hm = jnp.where(row < n_real, h, 0.0)
            stats_ref[...] = jnp.zeros_like(stats_ref)
            stats_ref[0:1, :] = jnp.sum(hm, axis=0, keepdims=True)
            stats_ref[1:2, :] = jnp.sum(hm * hm, axis=0, keepdims=True)


def aggregate(tile_ids, counts, a_bf16, xw_bf16, bias, *, n_real, row_tile,
              k_tile, compute_stats, xw_resident):
    n_pad = a_bf16.shape[0]
    f_pad = xw_bf16.shape[1]
    n_rt = n_pad // row_tile
    n_kt = n_pad // k_tile
    grid = (n_rt, n_kt)

    if xw_resident:
        xw_spec = pl.BlockSpec((n_pad, f_pad), lambda i, k, tids, cnts: (0, 0))
    else:
        xw_spec = pl.BlockSpec((k_tile, f_pad),
                               lambda i, k, tids, cnts: (tids[i, k], 0))

    in_specs = [
        pl.BlockSpec((row_tile, k_tile), lambda i, k, tids, cnts: (i, tids[i, k])),
        xw_spec,
        pl.BlockSpec((1, f_pad), lambda i, k, tids, cnts: (0, 0)),
    ]
    h_dtype = jnp.bfloat16 if compute_stats else jnp.float32
    h_spec = pl.BlockSpec((row_tile, f_pad), lambda i, k, tids, cnts: (i, 0))
    scratch = [pltpu.VMEM((row_tile, f_pad), jnp.float32)]

    if compute_stats:
        out_shape = (jax.ShapeDtypeStruct((n_pad, f_pad), h_dtype),
                     jax.ShapeDtypeStruct((n_rt * 8, f_pad), jnp.float32))
        out_specs = (h_spec,
                     pl.BlockSpec((8, f_pad), lambda i, k, tids, cnts: (i, 0)))
    else:
        out_shape = jax.ShapeDtypeStruct((n_pad, f_pad), h_dtype)
        out_specs = h_spec

    kernel = functools.partial(_aggregate_kernel, n_real=n_real,
                               row_tile=row_tile, k_tile=k_tile,
                               compute_stats=compute_stats,
                               xw_resident=xw_resident)
    return pl.pallas_call(
        kernel,
        out_shape=out_shape,
        grid_spec=pltpu.PrefetchScalarGridSpec(
            num_scalar_prefetch=2,
            grid=grid,
            in_specs=in_specs,
            out_specs=out_specs,
            scratch_shapes=scratch),
        compiler_params=pltpu.CompilerParams(
            dimension_semantics=("parallel", "arbitrary"),
            vmem_limit_bytes=_VMEM_LIMIT),
    )(tile_ids, counts, a_bf16, xw_bf16, bias)


# ---------------------------------------------------------------------------
# Plain-JAX glue
# ---------------------------------------------------------------------------
def build_normalized_adjacency(edge_index, num_nodes):
    """Dense A_hat = D^{-1/2} (A + remaining self-loops) D^{-1/2} matching PyG
    gcn_norm: existing self-loop edges (incl. duplicates) are kept; a unit
    self-loop is added only for nodes without one."""
    src, dst = edge_index[0], edge_index[1]
    a = jnp.zeros((num_nodes, num_nodes), jnp.float32).at[dst, src].add(1.0)
    has_self_loop = jnp.diag(a) > 0
    a = a + jnp.diag(jnp.where(has_self_loop, 0.0, 1.0))
    deg = jnp.sum(a, axis=1)
    dinv = jnp.where(deg > 0, jax.lax.rsqrt(deg), 0.0)
    return a * dinv[:, None] * dinv[None, :]


def init_params(key, num_node_features, hidden, num_layers):
    params = []
    f_in = num_node_features
    for _ in range(num_layers):
        key, wk = jax.random.split(key)
        limit = (6.0 / (f_in + hidden)) ** 0.5
        w = jax.random.uniform(wk, (f_in, hidden), jnp.float32, -limit, limit)
        params.append(dict(
            w=w,
            b=jnp.zeros((1, hidden), jnp.float32),
            gamma=jnp.ones((1, hidden), jnp.float32),
            beta=jnp.zeros((1, hidden), jnp.float32),
            alpha=jnp.ones((1, hidden), jnp.float32),   # GraphNorm mean_scale
        ))
        f_in = hidden
    return params


def _pad2(m, rows, cols):
    return jnp.zeros((rows, cols), m.dtype).at[:m.shape[0], :m.shape[1]].set(m)


def graph_convolutional_network_forward(x, edge_index, params):
    n_real, f_in = x.shape
    hidden = params[0]["w"].shape[1]
    num_layers = len(params)

    a_hat = build_normalized_adjacency(edge_index, n_real)

    f_in_pad = _round_up(f_in, LANE)
    f_pad = _round_up(hidden, LANE)
    n_pad, tile = _choose_node_padding(n_real, target=512)
    row_tile = k_tile = xw_row_tile = tile
    n_rt = n_pad // row_tile
    n_kt = n_pad // k_tile

    # bf16 adjacency halves the dominant HBM byte stream; matmuls accumulate in f32.
    # TODO(synk): fp8 A_hat on v7x / int8+scale on v5e-v6e to halve it again.
    a_pad_f32 = _pad2(a_hat, n_pad, n_pad)
    a_pad = a_pad_f32.astype(jnp.bfloat16)

    # Block-sparse occupancy of A_hat: per row tile, the occupied column-tile ids
    # packed to the front; remaining slots repeat the last valid id (DMA skipped
    # because the block index does not change) and are gated off in the kernel.
    occ = jnp.sum(jnp.abs(a_pad_f32).reshape(n_rt, row_tile, n_kt, k_tile),
                  axis=(1, 3)) > 0
    col = jnp.arange(n_kt, dtype=jnp.int32)[None, :]
    sort_key = jnp.where(occ, col, col + n_kt)
    order = jnp.argsort(sort_key, axis=1).astype(jnp.int32)
    counts = jnp.sum(occ, axis=1).astype(jnp.int32)
    last_valid = jnp.take_along_axis(order, jnp.maximum(counts - 1, 0)[:, None],
                                     axis=1)
    tile_ids = jnp.where(col < counts[:, None], order, last_valid)

    xw_resident = (n_pad * f_pad * 2) <= _XW_RESIDENT_BYTES

    h = _pad2(x.astype(jnp.float32), n_pad, f_in_pad)
    stats = None
    for i, p in enumerate(params):
        in_pad = f_in_pad if i == 0 else f_pad
        w_bf = _pad2(p["w"], in_pad, f_pad).astype(jnp.bfloat16)
        b_pad = _pad2(p["b"], 1, f_pad)

        if i == 0:
            xw = feature_transform(h, w_bf, n_real=n_real, row_tile=xw_row_tile)
        else:
            q = params[i - 1]                      # norm of the previous layer
            norm = (_pad2(q["gamma"], 1, in_pad),
                    _pad2(q["beta"], 1, in_pad),
                    _pad2(q["alpha"], 1, in_pad))
            xw = feature_transform(h, w_bf, norm=norm, stats=stats,
                                   n_real=n_real, row_tile=xw_row_tile)

        compute_stats = i < num_layers - 1
        out = aggregate(tile_ids, counts, a_pad, xw, b_pad,
                        n_real=n_real, row_tile=row_tile, k_tile=k_tile,
                        compute_stats=compute_stats, xw_resident=xw_resident)
        if compute_stats:
            h, stats_partial = out
            # cross-row-tile reduction of the GraphNorm partials (2*f_pad per tile)
            stats = stats_partial.reshape(n_rt, 8, f_pad).sum(axis=0)
        else:
            h = out

    return h[:n_real, :hidden]


# ---------------------------------------------------------------------------
# Plain-JAX reference (mirrors the kernel's cast / stats points) for validation
# ---------------------------------------------------------------------------
def _reference_forward(x, a_hat, params):
    a_bf = a_hat.astype(jnp.bfloat16)
    n = x.shape[0]
    num_layers = len(params)
    h_store = x.astype(jnp.float32)
    stats_sum = stats_sumsq = None
    for i, p in enumerate(params):
        h = h_store
        if i > 0:
            q = params[i - 1]
            mean = stats_sum / n
            mean_sq = stats_sumsq / n
            al = q["alpha"]
            var = jnp.maximum(mean_sq - (2.0 * al - al * al) * mean * mean, 0.0)
            h = q["gamma"] * (h - al * mean) * jax.lax.rsqrt(var + EPS) + q["beta"]
            h = jnp.maximum(h, 0.0)
        xw = jnp.dot(h.astype(jnp.bfloat16), p["w"].astype(jnp.bfloat16),
                     preferred_element_type=jnp.float32).astype(jnp.bfloat16)
        h_f32 = jnp.dot(a_bf, xw, preferred_element_type=jnp.float32) + p["b"]
        if i < num_layers - 1:
            stats_sum = jnp.sum(h_f32, axis=0, keepdims=True)
            stats_sumsq = jnp.sum(h_f32 * h_f32, axis=0, keepdims=True)
            h_store = h_f32.astype(jnp.bfloat16).astype(jnp.float32)
        else:
            h_store = h_f32
    return h_store


# ---------------------------------------------------------------------------
if __name__ == "__main__":
    key = jax.random.PRNGKey(0)

    num_nodes = 16
    num_node_features = 16
    graph_hidden_channels = 32
    num_layers = 3
    dropout = 0.5   # identity in eval mode

    k_src, k_dst, k_x, k_p = jax.random.split(key, 4)
    num_edges = 40
    src = jax.random.randint(k_src, (num_edges,), 0, num_nodes)
    dst = jax.random.randint(k_dst, (num_edges,), 0, num_nodes)
    edge_index = jnp.stack([src, dst]).astype(jnp.int32)          # (2, E)
    x = jax.random.normal(k_x, (num_nodes, num_node_features), jnp.float32)

    params = init_params(k_p, num_node_features, graph_hidden_channels, num_layers)

    fwd = jax.jit(graph_convolutional_network_forward)
    out = jax.block_until_ready(fwd(x, edge_index, params))

    assert out.shape == (num_nodes, graph_hidden_channels)
    assert bool(jnp.all(jnp.isfinite(out)))

    a_hat = build_normalized_adjacency(edge_index, num_nodes)
    ref = _reference_forward(x, a_hat, params)
    err = float(jnp.max(jnp.abs(out - ref)))
    assert err < 5e-2, f"mismatch vs reference: {err}"

    print("KERNEL_OK")
</pallas_src>

<mosaic_0001>
module attributes {stable_mosaic.version = 11 : i64} {
  func.func @_transform_kernel(%arg0: i32, %arg1: memref<128x128xf32, #tpu.memory_space<vmem>>, %arg2: memref<128x128xbf16, #tpu.memory_space<vmem>>, %arg3: memref<128x128xbf16, #tpu.memory_space<vmem>>) attributes {dimension_semantics = [#tpu.dimension_semantics<parallel>], iteration_bounds = array<i64: 1>, scalar_prefetch = 0 : i64, scratch_operands = 0 : i64, tpu.core_type = #tpu.core_type<tc>, window_params = [{transform_indices = @transform_0, window_bounds = array<i64: 128, 128>}, {pipeline_mode = #tpu.pipeline_mode<synchronous>, transform_indices = @transform_1, window_bounds = array<i64: 128, 128>}, {transform_indices = @transform_2, window_bounds = array<i64: 128, 128>}]} {
    %c0 = arith.constant 0 : index
    %c0_0 = arith.constant 0 : index
    %0 = vector.load %arg1[%c0, %c0_0] : memref<128x128xf32, #tpu.memory_space<vmem>>, vector<128x128xf32>
    %1 = arith.truncf %0 : vector<128x128xf32> to vector<128x128xbf16>
    %c0_1 = arith.constant 0 : index
    %c0_2 = arith.constant 0 : index
    %2 = vector.load %arg2[%c0_1, %c0_2] : memref<128x128xbf16, #tpu.memory_space<vmem>>, vector<128x128xbf16>
    %cst = arith.constant dense<0.000000e+00> : vector<128x128xf32>
    %3 = tpu.matmul %1, %2, %cst {dimension_numbers = #tpu.dot_dimension_numbers<[1], [0], [0], [1], [0, 0, 1, 1], [], []>} : vector<128x128xbf16>, vector<128x128xbf16>, vector<128x128xf32> -> vector<128x128xf32>
    %4 = arith.truncf %3 : vector<128x128xf32> to vector<128x128xbf16>
    %c0_3 = arith.constant 0 : index
    %c0_4 = arith.constant 0 : index
    %5 = vector.load %arg3[%c0_3, %c0_4] : memref<128x128xbf16, #tpu.memory_space<vmem>>, vector<128x128xbf16>
    tpu.vector_store %arg3[%c0_3, %c0_4], %4 {strides = array<i32>} : memref<128x128xbf16, #tpu.memory_space<vmem>>, vector<128x128xbf16>,
    return
  }
  func.func @transform_0(%arg0: i32) -> (i32, i32) {
    %c0_i32 = arith.constant 0 : i32
    %c0_i32_0 = arith.constant 0 : i32
    return %arg0, %c0_i32 : i32, i32
  }
  func.func @transform_1(%arg0: i32) -> (i32, i32) {
    %c0_i32 = arith.constant 0 : i32
    %c0_i32_0 = arith.constant 0 : i32
    %c0_i32_1 = arith.constant 0 : i32
    return %c0_i32, %c0_i32_0 : i32, i32
  }
  func.func @transform_2(%arg0: i32) -> (i32, i32) {
    %c0_i32 = arith.constant 0 : i32
    %c0_i32_0 = arith.constant 0 : i32
    return %arg0, %c0_i32 : i32, i32
  }
}

module attributes {stable_mosaic.version = 11 : i64} {
  func.func @_aggregate_kernel(%arg0: i32, %arg1: i32, %arg2: memref<1x1xi32, #tpu.memory_space<smem>>, %arg3: memref<1xi32, #tpu.memory_space<smem>>, %arg4: memref<128x128xbf16, #tpu.memory_space<vmem>>, %arg5: memref<128x128xbf16, #tpu.memory_space<vmem>>, %arg6: memref<1x128xf32, #tpu.memory_space<vmem>>, %arg7: memref<128x128xbf16, #tpu.memory_space<vmem>>, %arg8: memref<8x128xf32, #tpu.memory_space<vmem>>, %arg9: memref<128x128xf32, #tpu.memory_space<vmem>>) attributes {dimension_semantics = [#tpu.dimension_semantics<parallel>, #tpu.dimension_semantics<arbitrary>], iteration_bounds = array<i64: 1, 1>, scalar_prefetch = 2 : i64, scratch_operands = 1 : i64, tpu.core_type = #tpu.core_type<tc>, window_params = [{transform_indices = @transform_0, window_bounds = array<i64: 128, 128>}, {pipeline_mode = #tpu.pipeline_mode<synchronous>, transform_indices = @transform_1, window_bounds = array<i64: 128, 128>}, {pipeline_mode = #tpu.pipeline_mode<synchronous>, transform_indices = @transform_2, window_bounds = array<i64: 1, 128>}, {transform_indices = @transform_3, window_bounds = array<i64: 128, 128>}, {transform_indices = @transform_4, window_bounds = array<i64: 8, 128>}]} {
    %c0_i32 = arith.constant 0 : i32
    %0 = arith.cmpi eq, %arg1, %c0_i32 : i32
    %1 = arith.extui %0 : i1 to i32
    %c0_i32_0 = arith.constant 0 : i32
    %2 = arith.cmpi ne, %1, %c0_i32_0 : i32
    scf.if %2 {
      %cst = arith.constant 0.000000e+00 : f32
      %11 = vector.broadcast %cst : f32 to vector<128x128xf32>
      %c0 = arith.constant 0 : index
      %c0_4 = arith.constant 0 : index
      %12 = vector.load %arg9[%c0, %c0_4] : memref<128x128xf32, #tpu.memory_space<vmem>>, vector<128x128xf32>
      tpu.vector_store %arg9[%c0, %c0_4], %11 {strides = array<i32>} : memref<128x128xf32, #tpu.memory_space<vmem>>, vector<128x128xf32>,
    } else {
    }
    %3 = arith.index_cast %arg0 : i32 to index
    %4 = memref.load %arg3[%3] : memref<1xi32, #tpu.memory_space<smem>>
    %5 = arith.cmpi slt, %arg1, %4 : i32
    %6 = arith.extui %5 : i1 to i32
    %c0_i32_1 = arith.constant 0 : i32
    %7 = arith.cmpi ne, %6, %c0_i32_1 : i32
    scf.if %7 {
      %11 = arith.index_cast %arg0 : i32 to index
      %12 = arith.index_cast %arg1 : i32 to index
      %13 = memref.load %arg2[%11, %12] : memref<1x1xi32, #tpu.memory_space<smem>>
      %c128_i32 = arith.constant 128 : i32
      %14 = arith.muli %13, %c128_i32 : i32
      %15 = tpu.assume_multiple %14, 128 : i32
      %16 = arith.index_cast %15 : i32 to index
      %c0 = arith.constant 0 : index
      %17 = vector.load %arg5[%16, %c0] : memref<128x128xbf16, #tpu.memory_space<vmem>>, vector<128x128xbf16>
      %c0_4 = arith.constant 0 : index
      %c0_5 = arith.constant 0 : index
      %18 = vector.load %arg9[%c0_4, %c0_5] : memref<128x128xf32, #tpu.memory_space<vmem>>, vector<128x128xf32>
      %c0_6 = arith.constant 0 : index
      %c0_7 = arith.constant 0 : index
      %19 = vector.load %arg4[%c0_6, %c0_7] : memref<128x128xbf16, #tpu.memory_space<vmem>>, vector<128x128xbf16>
      %cst = arith.constant dense<0.000000e+00> : vector<128x128xf32>
      %20 = tpu.matmul %19, %17, %cst {dimension_numbers = #tpu.dot_dimension_numbers<[1], [0], [0], [1], [0, 0, 1, 1], [], []>} : vector<128x128xbf16>, vector<128x128xbf16>, vector<128x128xf32> -> vector<128x128xf32>
      %21 = arith.addf %18, %20 : vector<128x128xf32>
      %c0_8 = arith.constant 0 : index
      %c0_9 = arith.constant 0 : index
      %22 = vector.load %arg9[%c0_8, %c0_9] : memref<128x128xf32, #tpu.memory_space<vmem>>, vector<128x128xf32>
      tpu.vector_store %arg9[%c0_8, %c0_9], %21 {strides = array<i32>} : memref<128x128xf32, #tpu.memory_space<vmem>>, vector<128x128xf32>,
    } else {
    }
    %c0_i32_2 = arith.constant 0 : i32
    %8 = arith.cmpi eq, %arg1, %c0_i32_2 : i32
    %9 = arith.extui %8 : i1 to i32
    %c0_i32_3 = arith.constant 0 : i32
    %10 = arith.cmpi ne, %9, %c0_i32_3 : i32
    scf.if %10 {
      %c0 = arith.constant 0 : index
      %c0_4 = arith.constant 0 : index
      %11 = vector.load %arg9[%c0, %c0_4] : memref<128x128xf32, #tpu.memory_space<vmem>>, vector<128x128xf32>
      %c0_5 = arith.constant 0 : index
      %c0_6 = arith.constant 0 : index
      %12 = vector.load %arg6[%c0_5, %c0_6] : memref<1x128xf32, #tpu.memory_space<vmem>>, vector<1x128xf32>
      %13 = vector.broadcast %12 : vector<1x128xf32> to vector<128x128xf32>
      %14 = arith.addf %11, %13 : vector<128x128xf32>
      %15 = arith.truncf %14 : vector<128x128xf32> to vector<128x128xbf16>
      %c0_7 = arith.constant 0 : index
      %c0_8 = arith.constant 0 : index
      %16 = vector.load %arg7[%c0_7, %c0_8] : memref<128x128xbf16, #tpu.memory_space<vmem>>, vector<128x128xbf16>
      tpu.vector_store %arg7[%c0_7, %c0_8], %15 {strides = array<i32>} : memref<128x128xbf16, #tpu.memory_space<vmem>>, vector<128x128xbf16>,
      %17 = tpu.iota {dimensions = array<i32: 0>} : vector<128x128xi32>
      %c128_i32 = arith.constant 128 : i32
      %18 = arith.muli %arg0, %c128_i32 : i32
      %19 = vector.broadcast %18 : i32 to vector<128x128xi32>
      %20 = arith.addi %17, %19 : vector<128x128xi32>
      %c16_i32 = arith.constant 16 : i32
      %21 = vector.broadcast %c16_i32 : i32 to vector<128x128xi32>
      %22 = arith.cmpi slt, %20, %21 : vector<128x128xi32>
      %cst = arith.constant 0.000000e+00 : f32
      %23 = vector.broadcast %cst : f32 to vector<128x128xf32>
      %24 = arith.select %22, %14, %23 : vector<128x128xi1>, vector<128x128xf32>
      %cst_9 = arith.constant 0.000000e+00 : f32
      %25 = vector.broadcast %cst_9 : f32 to vector<8x128xf32>
      %c0_10 = arith.constant 0 : index
      %c0_11 = arith.constant 0 : index
      %26 = vector.load %arg8[%c0_10, %c0_11] : memref<8x128xf32, #tpu.memory_space<vmem>>, vector<8x128xf32>
      tpu.vector_store %arg8[%c0_10, %c0_11], %25 {strides = array<i32>} : memref<8x128xf32, #tpu.memory_space<vmem>>, vector<8x128xf32>,
      %cst_12 = arith.constant dense<0.000000e+00> : vector<128xf32>
      %27 = vector.multi_reduction <add>, %24, %cst_12 [0] : vector<128x128xf32> to vector<128xf32>
      %28 = vector.shape_cast %27 : vector<128xf32> to vector<1x128xf32>
      %c0_13 = arith.constant 0 : index
      %c0_14 = arith.constant 0 : index
      %29 = vector.load %arg8[%c0_13, %c0_14] : memref<8x128xf32, #tpu.memory_space<vmem>>, vector<1x128xf32>
      tpu.vector_store %arg8[%c0_13, %c0_14], %28 {strides = array<i32>} : memref<8x128xf32, #tpu.memory_space<vmem>>, vector<1x128xf32>,
      %30 = arith.mulf %24, %24 : vector<128x128xf32>
      %cst_15 = arith.constant dense<0.000000e+00> : vector<128xf32>
      %31 = vector.multi_reduction <add>, %30, %cst_15 [0] : vector<128x128xf32> to vector<128xf32>
      %32 = vector.shape_cast %31 : vector<128xf32> to vector<1x128xf32>
      %c1 = arith.constant 1 : index
      %c0_16 = arith.constant 0 : index
      %33 = vector.load %arg8[%c1, %c0_16] : memref<8x128xf32, #tpu.memory_space<vmem>>, vector<1x128xf32>
      tpu.vector_store %arg8[%c1, %c0_16], %32 {strides = array<i32>} : memref<8x128xf32, #tpu.memory_space<vmem>>, vector<1x128xf32>,
    } else {
    }
    return
  }
  func.func @transform_0(%arg0: i32, %arg1: i32, %arg2: memref<1x1xi32, #tpu.memory_space<smem>>, %arg3: memref<1xi32, #tpu.memory_space<smem>>) -> (i32, i32) {
    %0 = arith.index_cast %arg0 : i32 to index
    %1 = arith.index_cast %arg1 : i32 to index
    %2 = memref.load %arg2[%0, %1] : memref<1x1xi32, #tpu.memory_space<smem>>
    %c0_i32 = arith.constant 0 : i32
    return %arg0, %2 : i32, i32
  }
  func.func @transform_1(%arg0: i32, %arg1: i32, %arg2: memref<1x1xi32, #tpu.memory_space<smem>>, %arg3: memref<1xi32, #tpu.memory_space<smem>>) -> (i32, i32) {
    %c0_i32 = arith.constant 0 : i32
    %c0_i32_0 = arith.constant 0 : i32
    %c0_i32_1 = arith.constant 0 : i32
    return %c0_i32, %c0_i32_0 : i32, i32
  }
  func.func @transform_2(%arg0: i32, %arg1: i32, %arg2: memref<1x1xi32, #tpu.memory_space<smem>>, %arg3: memref<1xi32, #tpu.memory_space<smem>>) -> (i32, i32) {
    %c0_i32 = arith.constant 0 : i32
    %c0_i32_0 = arith.constant 0 : i32
    %c0_i32_1 = arith.constant 0 : i32
    return %c0_i32, %c0_i32_0 : i32, i32
  }
  func.func @transform_3(%arg0: i32, %arg1: i32, %arg2: memref<1x1xi32, #tpu.memory_space<smem>>, %arg3: memref<1xi32, #tpu.memory_space<smem>>) -> (i32, i32) {
    %c0_i32 = arith.constant 0 : i32
    %c0_i32_0 = arith.constant 0 : i32
    return %arg0, %c0_i32 : i32, i32
  }
  func.func @transform_4(%arg0: i32, %arg1: i32, %arg2: memref<1x1xi32, #tpu.memory_space<smem>>, %arg3: memref<1xi32, #tpu.memory_space<smem>>) -> (i32, i32) {
    %c0_i32 = arith.constant 0 : i32
    %c0_i32_0 = arith.constant 0 : i32
    return %arg0, %c0_i32 : i32, i32
  }
}

module attributes {stable_mosaic.version = 11 : i64} {
  func.func @_transform_kernel(%arg0: i32, %arg1: memref<128x128xbf16, #tpu.memory_space<vmem>>, %arg2: memref<128x128xbf16, #tpu.memory_space<vmem>>, %arg3: memref<1x128xf32, #tpu.memory_space<vmem>>, %arg4: memref<1x128xf32, #tpu.memory_space<vmem>>, %arg5: memref<1x128xf32, #tpu.memory_space<vmem>>, %arg6: memref<8x128xf32, #tpu.memory_space<vmem>>, %arg7: memref<128x128xbf16, #tpu.memory_space<vmem>>) attributes {dimension_semantics = [#tpu.dimension_semantics<parallel>], iteration_bounds = array<i64: 1>, scalar_prefetch = 0 : i64, scratch_operands = 0 : i64, tpu.core_type = #tpu.core_type<tc>, window_params = [{transform_indices = @transform_0, window_bounds = array<i64: 128, 128>}, {pipeline_mode = #tpu.pipeline_mode<synchronous>, transform_indices = @transform_1, window_bounds = array<i64: 128, 128>}, {pipeline_mode = #tpu.pipeline_mode<synchronous>, transform_indices = @transform_2, window_bounds = array<i64: 1, 128>}, {pipeline_mode = #tpu.pipeline_mode<synchronous>, transform_indices = @transform_3, window_bounds = array<i64: 1, 128>}, {pipeline_mode = #tpu.pipeline_mode<synchronous>, transform_indices = @transform_4, window_bounds = array<i64: 1, 128>}, {pipeline_mode = #tpu.pipeline_mode<synchronous>, transform_indices = @transform_5, window_bounds = array<i64: 8, 128>}, {transform_indices = @transform_6, window_bounds = array<i64: 128, 128>}]} {
    %c0 = arith.constant 0 : index
    %c0_0 = arith.constant 0 : index
    %0 = vector.load %arg1[%c0, %c0_0] : memref<128x128xbf16, #tpu.memory_space<vmem>>, vector<128x128xbf16>
    %1 = arith.extf %0 : vector<128x128xbf16> to vector<128x128xf32>
    %c0_1 = arith.constant 0 : index
    %c0_2 = arith.constant 0 : index
    %2 = vector.load %arg5[%c0_1, %c0_2] : memref<1x128xf32, #tpu.memory_space<vmem>>, vector<1x128xf32>
    %c0_3 = arith.constant 0 : index
    %c0_4 = arith.constant 0 : index
    %3 = vector.load %arg6[%c0_3, %c0_4] : memref<8x128xf32, #tpu.memory_space<vmem>>, vector<1x128xf32>
    %cst = arith.constant 6.250000e-02 : f32
    %4 = vector.broadcast %cst : f32 to vector<1x128xf32>
    %5 = arith.mulf %3, %4 : vector<1x128xf32>
    %c1 = arith.constant 1 : index
    %c0_5 = arith.constant 0 : index
    %6 = vector.load %arg6[%c1, %c0_5] : memref<8x128xf32, #tpu.memory_space<vmem>>, vector<1x128xf32>
    %cst_6 = arith.constant 6.250000e-02 : f32
    %7 = vector.broadcast %cst_6 : f32 to vector<1x128xf32>
    %8 = arith.mulf %6, %7 : vector<1x128xf32>
    %cst_7 = arith.constant 2.000000e+00 : f32
    %9 = vector.broadcast %cst_7 : f32 to vector<1x128xf32>
    %10 = arith.mulf %9, %2 : vector<1x128xf32>
    %11 = arith.mulf %2, %2 : vector<1x128xf32>
    %12 = arith.subf %10, %11 : vector<1x128xf32>
    %13 = arith.mulf %12, %5 : vector<1x128xf32>
    %14 = arith.mulf %13, %5 : vector<1x128xf32>
    %15 = arith.subf %8, %14 : vector<1x128xf32>
    %cst_8 = arith.constant 0.000000e+00 : f32
    %16 = vector.broadcast %cst_8 : f32 to vector<1x128xf32>
    %17 = arith.maximumf %15, %16 : vector<1x128xf32>
    %cst_9 = arith.constant 9.99999974E-6 : f32
    %18 = vector.broadcast %cst_9 : f32 to vector<1x128xf32>
    %19 = arith.addf %17, %18 : vector<1x128xf32>
    %20 = math.rsqrt %19 : vector<1x128xf32>
    %c0_10 = arith.constant 0 : index
    %c0_11 = arith.constant 0 : index
    %21 = vector.load %arg3[%c0_10, %c0_11] : memref<1x128xf32, #tpu.memory_space<vmem>>, vector<1x128xf32>
    %22 = arith.mulf %2, %5 : vector<1x128xf32>
    %23 = vector.broadcast %22 : vector<1x128xf32> to vector<128x128xf32>
    %24 = arith.subf %1, %23 : vector<128x128xf32>
    %25 = vector.broadcast %21 : vector<1x128xf32> to vector<128x128xf32>
    %26 = arith.mulf %25, %24 : vector<128x128xf32>
    %27 = vector.broadcast %20 : vector<1x128xf32> to vector<128x128xf32>
    %28 = arith.mulf %26, %27 : vector<128x128xf32>
    %c0_12 = arith.constant 0 : index
    %c0_13 = arith.constant 0 : index
    %29 = vector.load %arg4[%c0_12, %c0_13] : memref<1x128xf32, #tpu.memory_space<vmem>>, vector<1x128xf32>
    %30 = vector.broadcast %29 : vector<1x128xf32> to vector<128x128xf32>
    %31 = arith.addf %28, %30 : vector<128x128xf32>
    %cst_14 = arith.constant 0.000000e+00 : f32
    %32 = vector.broadcast %cst_14 : f32 to vector<128x128xf32>
    %33 = arith.maximumf %31, %32 : vector<128x128xf32>
    %34 = arith.truncf %33 : vector<128x128xf32> to vector<128x128xbf16>
    %c0_15 = arith.constant 0 : index
    %c0_16 = arith.constant 0 : index
    %35 = vector.load %arg2[%c0_15, %c0_16] : memref<128x128xbf16, #tpu.memory_space<vmem>>, vector<128x128xbf16>
    %cst_17 = arith.constant dense<0.000000e+00> : vector<128x128xf32>
    %36 = tpu.matmul %34, %35, %cst_17 {dimension_numbers = #tpu.dot_dimension_numbers<[1], [0], [0], [1], [0, 0, 1, 1], [], []>} : vector<128x128xbf16>, vector<128x128xbf16>, vector<128x128xf32> -> vector<128x128xf32>
    %37 = arith.truncf %36 : vector<128x128xf32> to vector<128x128xbf16>
    %c0_18 = arith.constant 0 : index
    %c0_19 = arith.constant 0 : index
    %38 = vector.load %arg7[%c0_18, %c0_19] : memref<128x128xbf16, #tpu.memory_space<vmem>>, vector<128x128xbf16>
    tpu.vector_store %arg7[%c0_18, %c0_19], %37 {strides = array<i32>} : memref<128x128xbf16, #tpu.memory_space<vmem>>, vector<128x128xbf16>,
    return
  }
  func.func @transform_0(%arg0: i32) -> (i32, i32) {
    %c0_i32 = arith.constant 0 : i32
    %c0_i32_0 = arith.constant 0 : i32
    return %arg0, %c0_i32 : i32, i32
  }
  func.func @transform_1(%arg0: i32) -> (i32, i32) {
    %c0_i32 = arith.constant 0 : i32
    %c0_i32_0 = arith.constant 0 : i32
    %c0_i32_1 = arith.constant 0 : i32
    return %c0_i32, %c0_i32_0 : i32, i32
  }
  func.func @transform_2(%arg0: i32) -> (i32, i32) {
    %c0_i32 = arith.constant 0 : i32
    %c0_i32_0 = arith.constant 0 : i32
    %c0_i32_1 = arith.constant 0 : i32
    return %c0_i32, %c0_i32_0 : i32, i32
  }
  func.func @transform_3(%arg0: i32) -> (i32, i32) {
    %c0_i32 = arith.constant 0 : i32
    %c0_i32_0 = arith.constant 0 : i32
    %c0_i32_1 = arith.constant 0 : i32
    return %c0_i32, %c0_i32_0 : i32, i32
  }
  func.func @transform_4(%arg0: i32) -> (i32, i32) {
    %c0_i32 = arith.constant 0 : i32
    %c0_i32_0 = arith.constant 0 : i32
    %c0_i32_1 = arith.constant 0 : i32
    return %c0_i32, %c0_i32_0 : i32, i32
  }
  func.func @transform_5(%arg0: i32) -> (i32, i32) {
    %c0_i32 = arith.constant 0 : i32
    %c0_i32_0 = arith.constant 0 : i32
    %c0_i32_1 = arith.constant 0 : i32
    return %c0_i32, %c0_i32_0 : i32, i32
  }
  func.func @transform_6(%arg0: i32) -> (i32, i32) {
    %c0_i32 = arith.constant 0 : i32
    %c0_i32_0 = arith.constant 0 : i32
    return %arg0, %c0_i32 : i32, i32
  }
}

module attributes {stable_mosaic.version = 11 : i64} {
  func.func @_aggregate_kernel(%arg0: i32, %arg1: i32, %arg2: memref<1x1xi32, #tpu.memory_space<smem>>, %arg3: memref<1xi32, #tpu.memory_space<smem>>, %arg4: memref<128x128xbf16, #tpu.memory_space<vmem>>, %arg5: memref<128x128xbf16, #tpu.memory_space<vmem>>, %arg6: memref<1x128xf32, #tpu.memory_space<vmem>>, %arg7: memref<128x128xf32, #tpu.memory_space<vmem>>, %arg8: memref<128x128xf32, #tpu.memory_space<vmem>>) attributes {dimension_semantics = [#tpu.dimension_semantics<parallel>, #tpu.dimension_semantics<arbitrary>], iteration_bounds = array<i64: 1, 1>, scalar_prefetch = 2 : i64, scratch_operands = 1 : i64, tpu.core_type = #tpu.core_type<tc>, window_params = [{transform_indices = @transform_0, window_bounds = array<i64: 128, 128>}, {pipeline_mode = #tpu.pipeline_mode<synchronous>, transform_indices = @transform_1, window_bounds = array<i64: 128, 128>}, {pipeline_mode = #tpu.pipeline_mode<synchronous>, transform_indices = @transform_2, window_bounds = array<i64: 1, 128>}, {transform_indices = @transform_3, window_bounds = array<i64: 128, 128>}]} {
    %c0_i32 = arith.constant 0 : i32
    %0 = arith.cmpi eq, %arg1, %c0_i32 : i32
    %1 = arith.extui %0 : i1 to i32
    %c0_i32_0 = arith.constant 0 : i32
    %2 = arith.cmpi ne, %1, %c0_i32_0 : i32
    scf.if %2 {
      %cst = arith.constant 0.000000e+00 : f32
      %11 = vector.broadcast %cst : f32 to vector<128x128xf32>
      %c0 = arith.constant 0 : index
      %c0_4 = arith.constant 0 : index
      %12 = vector.load %arg8[%c0, %c0_4] : memref<128x128xf32, #tpu.memory_space<vmem>>, vector<128x128xf32>
      tpu.vector_store %arg8[%c0, %c0_4], %11 {strides = array<i32>} : memref<128x128xf32, #tpu.memory_space<vmem>>, vector<128x128xf32>,
    } else {
    }
    %3 = arith.index_cast %arg0 : i32 to index
    %4 = memref.load %arg3[%3] : memref<1xi32, #tpu.memory_space<smem>>
    %5 = arith.cmpi slt, %arg1, %4 : i32
    %6 = arith.extui %5 : i1 to i32
    %c0_i32_1 = arith.constant 0 : i32
    %7 = arith.cmpi ne, %6, %c0_i32_1 : i32
    scf.if %7 {
      %11 = arith.index_cast %arg0 : i32 to index
      %12 = arith.index_cast %arg1 : i32 to index
      %13 = memref.load %arg2[%11, %12] : memref<1x1xi32, #tpu.memory_space<smem>>
      %c128_i32 = arith.constant 128 : i32
      %14 = arith.muli %13, %c128_i32 : i32
      %15 = tpu.assume_multiple %14, 128 : i32
      %16 = arith.index_cast %15 : i32 to index
      %c0 = arith.constant 0 : index
      %17 = vector.load %arg5[%16, %c0] : memref<128x128xbf16, #tpu.memory_space<vmem>>, vector<128x128xbf16>
      %c0_4 = arith.constant 0 : index
      %c0_5 = arith.constant 0 : index
      %18 = vector.load %arg8[%c0_4, %c0_5] : memref<128x128xf32, #tpu.memory_space<vmem>>, vector<128x128xf32>
      %c0_6 = arith.constant 0 : index
      %c0_7 = arith.constant 0 : index
      %19 = vector.load %arg4[%c0_6, %c0_7] : memref<128x128xbf16, #tpu.memory_space<vmem>>, vector<128x128xbf16>
      %cst = arith.constant dense<0.000000e+00> : vector<128x128xf32>
      %20 = tpu.matmul %19, %17, %cst {dimension_numbers = #tpu.dot_dimension_numbers<[1], [0], [0], [1], [0, 0, 1, 1], [], []>} : vector<128x128xbf16>, vector<128x128xbf16>, vector<128x128xf32> -> vector<128x128xf32>
      %21 = arith.addf %18, %20 : vector<128x128xf32>
      %c0_8 = arith.constant 0 : index
      %c0_9 = arith.constant 0 : index
      %22 = vector.load %arg8[%c0_8, %c0_9] : memref<128x128xf32, #tpu.memory_space<vmem>>, vector<128x128xf32>
      tpu.vector_store %arg8[%c0_8, %c0_9], %21 {strides = array<i32>} : memref<128x128xf32, #tpu.memory_space<vmem>>, vector<128x128xf32>,
    } else {
    }
    %c0_i32_2 = arith.constant 0 : i32
    %8 = arith.cmpi eq, %arg1, %c0_i32_2 : i32
    %9 = arith.extui %8 : i1 to i32
    %c0_i32_3 = arith.constant 0 : i32
    %10 = arith.cmpi ne, %9, %c0_i32_3 : i32
    scf.if %10 {
      %c0 = arith.constant 0 : index
      %c0_4 = arith.constant 0 : index
      %11 = vector.load %arg8[%c0, %c0_4] : memref<128x128xf32, #tpu.memory_space<vmem>>, vector<128x128xf32>
      %c0_5 = arith.constant 0 : index
      %c0_6 = arith.constant 0 : index
      %12 = vector.load %arg6[%c0_5, %c0_6] : memref<1x128xf32, #tpu.memory_space<vmem>>, vector<1x128xf32>
      %13 = vector.broadcast %12 : vector<1x128xf32> to vector<128x128xf32>
      %14 = arith.addf %11, %13 : vector<128x128xf32>
      %c0_7 = arith.constant 0 : index
      %c0_8 = arith.constant 0 : index
      %15 = vector.load %arg7[%c0_7, %c0_8] : memref<128x128xf32, #tpu.memory_space<vmem>>, vector<128x128xf32>
      tpu.vector_store %arg7[%c0_7, %c0_8], %14 {strides = array<i32>} : memref<128x128xf32, #tpu.memory_space<vmem>>, vector<128x128xf32>,
    } else {
    }
    return
  }
  func.func @transform_0(%arg0: i32, %arg1: i32, %arg2: memref<1x1xi32, #tpu.memory_space<smem>>, %arg3: memref<1xi32, #tpu.memory_space<smem>>) -> (i32, i32) {
    %0 = arith.index_cast %arg0 : i32 to index
    %1 = arith.index_cast %arg1 : i32 to index
    %2 = memref.load %arg2[%0, %1] : memref<1x1xi32, #tpu.memory_space<smem>>
    %c0_i32 = arith.constant 0 : i32
    return %arg0, %2 : i32, i32
  }
  func.func @transform_1(%arg0: i32, %arg1: i32, %arg2: memref<1x1xi32, #tpu.memory_space<smem>>, %arg3: memref<1xi32, #tpu.memory_space<smem>>) -> (i32, i32) {
    %c0_i32 = arith.constant 0 : i32
    %c0_i32_0 = arith.constant 0 : i32
    %c0_i32_1 = arith.constant 0 : i32
    return %c0_i32, %c0_i32_0 : i32, i32
  }
  func.func @transform_2(%arg0: i32, %arg1: i32, %arg2: memref<1x1xi32, #tpu.memory_space<smem>>, %arg3: memref<1xi32, #tpu.memory_space<smem>>) -> (i32, i32) {
    %c0_i32 = arith.constant 0 : i32
    %c0_i32_0 = arith.constant 0 : i32
    %c0_i32_1 = arith.constant 0 : i32
    return %c0_i32, %c0_i32_0 : i32, i32
  }
  func.func @transform_3(%arg0: i32, %arg1: i32, %arg2: memref<1x1xi32, #tpu.memory_space<smem>>, %arg3: memref<1xi32, #tpu.memory_space<smem>>) -> (i32, i32) {
    %c0_i32 = arith.constant 0 : i32
    %c0_i32_0 = arith.constant 0 : i32
    return %arg0, %c0_i32 : i32, i32
  }
}

</mosaic_0001>

<bundles_post_ra>
// kernel: graph_convolutional_network_forward.6
= control target key start
LH: loop header
LB: loop body
LE: loop exit
PB: predicated region body
PF: predicated region fallthrough
CT: control target
= control target key end

     0   :  { %s551_s1 = inlined_call_operand.vmem [shape: bf16[128,128], index: 1, kind: input, shape index: {}]   ;;  %s552_s0 = inlined_call_operand.vmem [shape: f32[128,128], index: 0, kind: input, shape index: {}]   ;;  %s553_s2 = inlined_call_operand.vmem [shape: bf16[128,128], index: 2, kind: output, shape index: {}]  }
   0x1   :  { %v432_v0 = vld [vmem:[%s551_s1] sm:$0xff]   ;;  %v433_v1 = vld [vmem:[%s551_s1 + $0x8] sm:$0xff]   ;;  %v434_v2 = vld [vmem:[%s551_s1 + $0x10] sm:$0xff]  }
   0x2   :  { %384 = vmatprep.subr.bf16.mxu0 %v432_v0  ;;  %416 = vmatprep.subr.bf16.mxu1 %v432_v0  ;;  %v435_v3 = vld [vmem:[%s551_s1 + $0x18] sm:$0xff]   ;;  %v12_v4 = vld [vmem:[%s552_s0] sm:$0xff]  ;;  %v13_v5 = vld [vmem:[%s552_s0 + $0x8] sm:$0xff] }
   0x3   :  { %385 = vmatpush3.bf16.msra.mxu0 %v432_v0  ;;  %424 = vmatpush3.bf16.msra.mxu1 %v432_v0  ;;  %v20_v6 = vld [vmem:[%s552_s0 + $0x40] sm:$0xff]  ;;  %v28_v7 = vpack.c.bf16 %v13_v5, %v12_v4  ;;  %v21_v8 = vld [vmem:[%s552_s0 + $0x48] sm:$0xff]  ;;  %v438_v12 = vld [vmem:[%s551_s1 + $0x30] sm:$0xff]  }
   0x4   :  { %386 = vmatprep.subr.bf16.mxu0 %v433_v1  ;;  %417 = vmatprep.subr.bf16.mxu1 %v433_v1  ;;  %v32_v9 = vpack.c.bf16 %v21_v8, %v20_v6  ;;  %v436_v10 = vld [vmem:[%s551_s1 + $0x20] sm:$0xff]   ;;  %v437_v11 = vld [vmem:[%s551_s1 + $0x28] sm:$0xff]   ;;  %v439_v13 = vld [vmem:[%s551_s1 + $0x38] sm:$0xff]  }
   0x5   :  { %400 = vmatprep.mubr.bf16.mxu0 %v28_v7  ;;  %v14_v14 = vld [vmem:[%s552_s0 + $0x10] sm:$0xff]  ;;  %v15_v15 = vld [vmem:[%s552_s0 + $0x18] sm:$0xff]  ;;  %v16_v18 = vld [vmem:[%s552_s0 + $0x20] sm:$0xff] }
   0x6   :  { %408 = vmatprep.mubr.bf16.mxu1 %v32_v9  ;;  %v22_v16 = vld [vmem:[%s552_s0 + $0x50] sm:$0xff]  ;;  %v23_v17 = vld [vmem:[%s552_s0 + $0x58] sm:$0xff]  ;;  %v17_v19 = vld [vmem:[%s552_s0 + $0x28] sm:$0xff]  ;;  %v29_v22 = vpack.c.bf16 %v15_v15, %v14_v14 }
   0x7   :  { %387 = vmatpush3.bf16.msra.mxu0 %v433_v1  ;;  %425 = vmatpush3.bf16.msra.mxu1 %v433_v1  ;;  %v24_v20 = vld [vmem:[%s552_s0 + $0x60] sm:$0xff]  ;;  %v25_v21 = vld [vmem:[%s552_s0 + $0x68] sm:$0xff]  ;;  %v33_v23 = vpack.c.bf16 %v23_v17, %v22_v16  ;;  %v30_v24 = vpack.c.bf16 %v17_v19, %v16_v18  ;;  %v18_v26 = vld [vmem:[%s552_s0 + $0x30] sm:$0xff] }
   0x8   :  { %388 = vmatprep.subr.bf16.mxu0 %v434_v2  ;;  %418 = vmatprep.subr.bf16.mxu1 %v434_v2  ;;  %v34_v25 = vpack.c.bf16 %v25_v21, %v24_v20  ;;  %v19_v27 = vld [vmem:[%s552_s0 + $0x38] sm:$0xff]  ;;  %v26_v28 = vld [vmem:[%s552_s0 + $0x70] sm:$0xff] }
   0x9   :  { %v27_v29 = vld [vmem:[%s552_s0 + $0x78] sm:$0xff]  ;;  %v31_v30 = vpack.c.bf16 %v19_v27, %v18_v26 }
   0xa   :  { %v35_v31 = vpack.c.bf16 %v27_v29, %v26_v28 }
   0xb   :  { %389 = vmatpush3.bf16.msra.mxu0 %v434_v2  ;;  %426 = vmatpush3.bf16.msra.mxu1 %v434_v2 }
   0xc   :  { %390 = vmatprep.subr.bf16.mxu0 %v435_v3  ;;  %419 = vmatprep.subr.bf16.mxu1 %v435_v3 }
   0xf   :  { %391 = vmatpush3.bf16.msra.mxu0 %v435_v3  ;;  %427 = vmatpush3.bf16.msra.mxu1 %v435_v3 }
  0x10   :  { %392 = vmatprep.subr.bf16.mxu0 %v436_v10  ;;  %420 = vmatprep.subr.bf16.mxu1 %v436_v10 }
  0x13   :  { %393 = vmatpush3.bf16.msra.mxu0 %v436_v10  ;;  %428 = vmatpush3.bf16.msra.mxu1 %v436_v10 }
  0x14   :  { %394 = vmatprep.subr.bf16.mxu0 %v437_v11  ;;  %421 = vmatprep.subr.bf16.mxu1 %v437_v11 }
  0x17   :  { %395 = vmatpush3.bf16.msra.mxu0 %v437_v11  ;;  %429 = vmatpush3.bf16.msra.mxu1 %v437_v11 }
  0x18   :  { %396 = vmatprep.subr.bf16.mxu0 %v438_v12  ;;  %422 = vmatprep.subr.bf16.mxu1 %v438_v12 }
  0x1b   :  { %397 = vmatpush3.bf16.msra.mxu0 %v438_v12  ;;  %430 = vmatpush3.bf16.msra.mxu1 %v438_v12 }
  0x1c   :  { %398 = vmatprep.subr.bf16.mxu0 %v439_v13  ;;  %423 = vmatprep.subr.bf16.mxu1 %v439_v13 }
  0x1f   :  { %399 = vmatpush3.bf16.msra.mxu0 %v439_v13  ;;  %431 = vmatpush3.bf16.msra.mxu1 %v439_v13 }
  0x22   :  { %401 = vmatmul.mubr.bf16.vlgmr.msra.gmra.mrb[0].mxu0 %v29_v22  ;;  %409 = vmatmul.mubr.bf16.vlgmr.msra.gmra.mrb[0].mxu1 %v33_v23 }
  0x23   :  { %404 = vmatprep.mubr.bf16.mxu0 %v30_v24  ;;  %412 = vmatprep.mubr.bf16.mxu1 %v34_v25 }
  0x2a   :  { %405 = vmatmul.mubr.bf16.gmra.mrb[4].mxu0 %v31_v30  ;;  %413 = vmatmul.mubr.bf16.gmra.mrb[4].mxu1 %v35_v31 }
  0xf5   :  { %v402_v32 = vpop.f32.mrb[0].mxu0  ;;  %v410_v33 = vpop.f32.mrb[0].mxu1 }
  0xf6   :  { %v134_v34 = vpop.f32.mrb[1].mxu0  ;;  %v166_v35 = vpop.f32.mrb[1].mxu1 }
  0xf7   :  { %v403_v36 = vpop.f32.mrb[2].mxu0  ;;  %v411_v37 = vpop.f32.mrb[2].mxu1 }
  0xf8   :  { %v329_v38 = vpack.c.bf16 %v403_v36, %v402_v32  ;;  %v349_v39 = vpack.c.bf16 %v411_v37, %v410_v33  ;;  %v137_v40 = vpop.f32.mrb[3].mxu0  ;;  %v169_v41 = vpop.f32.mrb[3].mxu1 }
  0xf9   :  { %v324_v42 = vpack.c.bf16 %v137_v40, %v134_v34  ;;  %v344_v43 = vpack.c.bf16 %v169_v41, %v166_v35 }
  0xfa   :  { %361 = vst [vmem:[%s553_s2 + $0x8] sm:$0xff] %v329_v38   ;;  %365 = vst [vmem:[%s553_s2 + $0x28] sm:$0xff] %v349_v39  }
  0xfb   :  { %325 = vst [vmem:[%s553_s2] sm:$0xff] %v324_v42   ;;  %364 = vst [vmem:[%s553_s2 + $0x20] sm:$0xff] %v344_v43  }
  0xfd   :  { %v406_v44 = vpop.f32.mrb[4].mxu0  ;;  %v414_v45 = vpop.f32.mrb[4].mxu1 }
  0xfe   :  { %v150_v46 = vpop.f32.mrb[5].mxu0  ;;  %v182_v47 = vpop.f32.mrb[5].mxu1 }
  0xff   :  { %v407_v48 = vpop.f32.mrb[6].mxu0  ;;  %v415_v49 = vpop.f32.mrb[6].mxu1 }
 0x100   :  { %v339_v50 = vpack.c.bf16 %v407_v48, %v406_v44  ;;  %v359_v51 = vpack.c.bf16 %v415_v49, %v414_v45  ;;  %v153_v52 = vpop.f32.mrb[7].mxu0  ;;  %v185_v53 = vpop.f32.mrb[7].mxu1 }
 0x101   :  { %v334_v54 = vpack.c.bf16 %v153_v52, %v150_v46  ;;  %v354_v55 = vpack.c.bf16 %v185_v53, %v182_v47 }
 0x102   :  { %363 = vst [vmem:[%s553_s2 + $0x18] sm:$0xff] %v339_v50   ;;  %367 = vst [vmem:[%s553_s2 + $0x38] sm:$0xff] %v359_v51  }
 0x103   :  { %362 = vst [vmem:[%s553_s2 + $0x10] sm:$0xff] %v334_v54   ;;  %366 = vst [vmem:[%s553_s2 + $0x30] sm:$0xff] %v354_v55  }

// kernel: graph_convolutional_network_forward.8
= control target key start
LH: loop header
LB: loop body
LE: loop exit
PB: predicated region body
PF: predicated region fallthrough
CT: control target
= control target key end

     0   :  { %v73_v7 = vlaneseq  ;;  %s759_s1 = inlined_call_operand.vmem [shape: bf16[128,128], index: 1, kind: input, shape index: {}]   ;;  %s760_s4 = inlined_call_operand.vmem [shape: f32[1,128], index: 4, kind: input, shape index: {}]   ;;  %s761_s5 = inlined_call_operand.vmem [shape: f32[8,128], index: 5, kind: input, shape index: {}]   ;;  %s762_s0 = inlined_call_operand.vmem [shape: bf16[128,128], index: 0, kind: input, shape index: {}]   ;;  %s763_s2 = inlined_call_operand.vmem [shape: f32[1,128], index: 2, kind: input, shape index: {}]   ;;  %s764_s3 = inlined_call_operand.vmem [shape: f32[1,128], index: 3, kind: input, shape index: {}]   ;;  %s765_s6 = inlined_call_operand.vmem [shape: bf16[128,128], index: 6, kind: output, shape index: {}]  }
   0x1   :  { %v620_v0 = vld [vmem:[%s759_s1] sm:$0xff]   ;;  %v621_v1 = vld [vmem:[%s759_s1 + $0x8] sm:$0xff]   ;;  %v622_v2 = vld [vmem:[%s759_s1 + $0x10] sm:$0xff]  }
   0x2   :  { %572 = vmatprep.subr.bf16.mxu0 %v620_v0  ;;  %604 = vmatprep.subr.bf16.mxu1 %v620_v0  ;;  %v623_v3 = vld [vmem:[%s759_s1 + $0x18] sm:$0xff]   ;;  %v56_v4 = vld [vmem:[%s760_s4] sm:$0x1]  ;;  %v59_v10 = vld [vmem:[%s761_s5 + $0x1] sm:$0x1]  ;;  %v689_v13 = vshrl.u32 %v73_v7, 7 }
   0x3   :  { %573 = vmatpush3.bf16.msra.mxu0 %v620_v0  ;;  %612 = vmatpush3.bf16.msra.mxu1 %v620_v0  ;;  %v57_v5 = vld [vmem:[%s761_s5] sm:$0x1]  ;;  %v61_v6 = vmul.f32 2.0, %v56_v4  ;;  %v62_v9 = vmul.f32 %v56_v4, %v56_v4  ;;  %v60_v14 = vmul.f32 0.0625, %v59_v10  ;;  %v625_v16 = vld [vmem:[%s759_s1 + $0x28] sm:$0xff]   ;;  %v626_v22 = vld [vmem:[%s759_s1 + $0x30] sm:$0xff]  }
   0x4   :  { %574 = vmatprep.subr.bf16.mxu0 %v621_v1  ;;  %605 = vmatprep.subr.bf16.mxu1 %v621_v1  ;;  %v58_v8 = vmul.f32 0.0625, %v57_v5  ;;  %v624_v11 = vld [vmem:[%s759_s1 + $0x20] sm:$0xff]   ;;  %v75_v19 = vsub.s32 0, %v689_v13  ;;  %v542_v28 = vld [vmem:[%s762_s0 + $0x8] sm:$0xff]   ;;  %v543_v30 = vld [vmem:[%s762_s0 + $0x10] sm:$0xff]  }
   0x5   :  { %v63_v12 = vsub.f32 %v61_v6, %v62_v9  ;;  %v471_v20 = vld [vmem:[%s762_s0] sm:$0xff]   ;;  %v546_v29 = vld [vmem:[%s762_s0 + $0x28] sm:$0xff]   ;;  %v627_v31 = vld [vmem:[%s759_s1 + $0x38] sm:$0xff]   ;;  %v476_v38 = vunpack.c.l.bf16 %v542_v28  ;;  %v477_v41 = vunpack.c.h.bf16 %v542_v28  ;;  %v480_v44 = vunpack.c.l.bf16 %v543_v30 }
   0x6   :  { %v71_v18 = vmul.f32 %v58_v8, %v56_v4  ;;  %v472_v24 = vunpack.c.l.bf16 %v471_v20  ;;  %v545_v27 = vld [vmem:[%s762_s0 + $0x20] sm:$0xff]   ;;  %v473_v32 = vunpack.c.h.bf16 %v471_v20  ;;  %v547_v33 = vld [vmem:[%s762_s0 + $0x30] sm:$0xff]   ;;  %v544_v34 = vld [vmem:[%s762_s0 + $0x18] sm:$0xff]   ;;  %v492_v42 = vunpack.c.l.bf16 %v546_v29 }
   0x7   :  { %575 = vmatpush3.bf16.msra.mxu0 %v621_v1  ;;  %613 = vmatpush3.bf16.msra.mxu1 %v621_v1  ;;  %v64_v15 = vmul.f32 %v63_v12, %v58_v8  ;;  %v488_v36 = vunpack.c.l.bf16 %v545_v27  ;;  %v489_v37 = vunpack.c.h.bf16 %v545_v27  ;;  %v548_v39 = vld [vmem:[%s762_s0 + $0x38] sm:$0xff]   ;;  %v428_v40 = vld [vmem:[%s763_s2] ss:$0 sm:$0xff]  ;;  %v493_v43 = vunpack.c.h.bf16 %v546_v29 }
   0x8   :  { %576 = vmatprep.subr.bf16.mxu0 %v622_v2  ;;  %606 = vmatprep.subr.bf16.mxu1 %v622_v2  ;;  %v76_v25 = vrot.slane %v71_v18, %v75_v19  ;;  %v481_v45 = vunpack.c.h.bf16 %v543_v30  ;;  %v496_v46 = vunpack.c.l.bf16 %v547_v33  ;;  %v497_v47 = vunpack.c.h.bf16 %v547_v33  ;;  %v429_v18 = vld [vmem:[%s764_s3] ss:$0 sm:$0xff] }
   0x9   :  { %v65_v17 = vmul.f32 %v64_v15, %v58_v8  ;;  %v484_v48 = vunpack.c.l.bf16 %v544_v34  ;;  %v485_v50 = vunpack.c.h.bf16 %v544_v34  ;;  %v500_v51 = vunpack.c.l.bf16 %v548_v39 }
   0xa   :  { %v78_v35 = vsub.f32 %v472_v24, %v76_v25  ;;  %v79_v49 = vsub.f32 %v473_v32, %v76_v25  ;;  %v501_v52 = vunpack.c.h.bf16 %v548_v39  ;;  %v86_v54 = vsub.f32 %v488_v36, %v76_v25 }
   0xb   :  { %577 = vmatpush3.bf16.msra.mxu0 %v622_v2  ;;  %614 = vmatpush3.bf16.msra.mxu1 %v622_v2  ;;  %v66_v21 = vsub.f32 %v60_v14, %v65_v17  ;;  %v87_v55 = vsub.f32 %v489_v37, %v76_v25  ;;  %v80_v56 = vsub.f32 %v476_v38, %v76_v25 }
   0xc   :  { %578 = vmatprep.subr.bf16.mxu0 %v623_v3  ;;  %607 = vmatprep.subr.bf16.mxu1 %v623_v3  ;;  %v100_v53 = vmul.f32 %v428_v40, %v78_v35  ;;  %v81_v57 = vsub.f32 %v477_v41, %v76_v25  ;;  %v88_v58 = vsub.f32 %v492_v42, %v76_v25 }
   0xd   :  { %v67_v23 = vmax.f32 %v66_v21, 0.0  ;;  %v89_v59 = vsub.f32 %v493_v43, %v76_v25  ;;  %v82_v60 = vsub.f32 %v480_v44, %v76_v25  ;;  %v83_v61 = vsub.f32 %v481_v45, %v76_v25 }
   0xe   :  { %v90_v62 = vsub.f32 %v496_v46, %v76_v25  ;;  %v91_v63 = vsub.f32 %v497_v47, %v76_v25  ;;  %v84_v0 = vsub.f32 %v484_v48, %v76_v25  ;;  %v85_v1 = vsub.f32 %v485_v50, %v76_v25 }
   0xf   :  { %579 = vmatpush3.bf16.msra.mxu0 %v623_v3  ;;  %615 = vmatpush3.bf16.msra.mxu1 %v623_v3  ;;  %v68_v26 = vadd.f32 1e-05, %v67_v23  ;;  %v92_v2 = vsub.f32 %v500_v51, %v76_v25  ;;  %v93_v3 = vsub.f32 %v501_v52, %v76_v25  ;;  %v101_v4 = vmul.f32 %v428_v40, %v79_v49 }
  0x10   :  { %580 = vmatprep.subr.bf16.mxu0 %v624_v11  ;;  %608 = vmatprep.subr.bf16.mxu1 %v624_v11  ;;  %v108_v5 = vmul.f32 %v428_v40, %v86_v54  ;;  %v109_v6 = vmul.f32 %v428_v40, %v87_v55  ;;  %v102_v7 = vmul.f32 %v428_v40, %v80_v56 }
  0x11   :  { %628 = vrsqrt.f32 %v68_v26  ;;  %v103_v9 = vmul.f32 %v428_v40, %v81_v57  ;;  %v110_v10 = vmul.f32 %v428_v40, %v88_v58  ;;  %v104_v12 = vmul.f32 %v428_v40, %v82_v60 }
  0x12   :  { %v105_v15 = vmul.f32 %v428_v40, %v83_v61  ;;  %v113_v17 = vmul.f32 %v428_v40, %v91_v63  ;;  %v106_v20 = vmul.f32 %v428_v40, %v84_v0  ;;  %v107_v21 = vmul.f32 %v428_v40, %v85_v1 }
  0x13   :  { %581 = vmatpush3.bf16.msra.mxu0 %v624_v11  ;;  %616 = vmatpush3.bf16.msra.mxu1 %v624_v11  ;;  %v111_v11 = vmul.f32 %v428_v40, %v89_v59  ;;  %v115_v23 = vmul.f32 %v428_v40, %v93_v3 }
  0x14   :  { %582 = vmatprep.subr.bf16.mxu0 %v625_v16  ;;  %609 = vmatprep.subr.bf16.mxu1 %v625_v16 }
  0x17   :  { %583 = vmatpush3.bf16.msra.mxu0 %v625_v16  ;;  %617 = vmatpush3.bf16.msra.mxu1 %v625_v16  ;;  %v112_v16 = vmul.f32 %v428_v40, %v90_v62 }
  0x18   :  { %584 = vmatprep.subr.bf16.mxu0 %v626_v22  ;;  %610 = vmatprep.subr.bf16.mxu1 %v626_v22 }
  0x1b   :  { %585 = vmatpush3.bf16.msra.mxu0 %v626_v22  ;;  %618 = vmatpush3.bf16.msra.mxu1 %v626_v22  ;;  %v629_v8 = vpop.eup %628  ;;  %v114_v22 = vmul.f32 %v428_v40, %v92_v2 }
  0x1c   :  { %586 = vmatprep.subr.bf16.mxu0 %v627_v31  ;;  %611 = vmatprep.subr.bf16.mxu1 %v627_v31  ;;  %v119_v14 = vrot.slane %v629_v8, %v75_v19 }
  0x1e   :  { %v120_v24 = vmul.f32 %v119_v14, %v100_v53  ;;  %v121_v25 = vmul.f32 %v119_v14, %v101_v4  ;;  %v128_v26 = vmul.f32 %v119_v14, %v108_v5  ;;  %v129_v27 = vmul.f32 %v119_v14, %v109_v6 }
  0x1f   :  { %587 = vmatpush3.bf16.msra.mxu0 %v627_v31  ;;  %619 = vmatpush3.bf16.msra.mxu1 %v627_v31  ;;  %v122_v28 = vmul.f32 %v119_v14, %v102_v7  ;;  %v123_v29 = vmul.f32 %v119_v14, %v103_v9  ;;  %v130_v30 = vmul.f32 %v119_v14, %v110_v10 }
  0x20   :  { %v131_v13 = vmul.f32 %v119_v14, %v111_v11  ;;  %v143_v19 = vadd.f32 %v429_v18, %v120_v24  ;;  %v144_v31 = vadd.f32 %v429_v18, %v121_v25  ;;  %v151_v32 = vadd.f32 %v429_v18, %v128_v26 }
  0x21   :  { %v152_v33 = vadd.f32 %v429_v18, %v129_v27  ;;  %v145_v34 = vadd.f32 %v429_v18, %v122_v28  ;;  %v146_v35 = vadd.f32 %v429_v18, %v123_v29  ;;  %v153_v36 = vadd.f32 %v429_v18, %v130_v30 }
  0x22   :  { %v154_v37 = vadd.f32 %v429_v18, %v131_v13  ;;  %v159_v38 = vmax.f32 %v143_v19, 0.0  ;;  %v160_v39 = vmax.f32 %v144_v31, 0.0  ;;  %v167_v41 = vmax.f32 %v151_v32, 0.0 }
  0x23   :  { %v168_v40 = vmax.f32 %v152_v33, 0.0  ;;  %v161_v42 = vmax.f32 %v145_v34, 0.0  ;;  %v162_v43 = vmax.f32 %v146_v35, 0.0  ;;  %v169_v44 = vmax.f32 %v153_v36, 0.0 }
  0x24   :  { %v170_v45 = vmax.f32 %v154_v37, 0.0  ;;  %v175_v46 = vpack.c.bf16 %v160_v39, %v159_v38  ;;  %v124_v48 = vmul.f32 %v119_v14, %v104_v12  ;;  %v125_v49 = vmul.f32 %v119_v14, %v105_v15 }
  0x25   :  { %v179_v47 = vpack.c.bf16 %v168_v40, %v167_v41  ;;  %v176_v50 = vpack.c.bf16 %v162_v43, %v161_v42  ;;  %v132_v52 = vmul.f32 %v119_v14, %v112_v16  ;;  %v133_v53 = vmul.f32 %v119_v14, %v113_v17 }
  0x26   :  { %v180_v51 = vpack.c.bf16 %v170_v45, %v169_v44  ;;  %588 = vmatprep.mubr.bf16.mxu0 %v175_v46  ;;  %v147_v54 = vadd.f32 %v429_v18, %v124_v48  ;;  %v148_v55 = vadd.f32 %v429_v18, %v125_v49  ;;  %v126_v56 = vmul.f32 %v119_v14, %v106_v20 }
  0x27   :  { %596 = vmatprep.mubr.bf16.mxu1 %v179_v47  ;;  %589 = vmatmul.mubr.bf16.vlgmr.msra.gmra.mrb[0].mxu0 %v176_v50  ;;  %v155_v57 = vadd.f32 %v429_v18, %v132_v52  ;;  %v156_v58 = vadd.f32 %v429_v18, %v133_v53  ;;  %v127_v59 = vmul.f32 %v119_v14, %v107_v21 }
  0x28   :  { %597 = vmatmul.mubr.bf16.vlgmr.msra.gmra.mrb[0].mxu1 %v180_v51  ;;  %v163_v60 = vmax.f32 %v147_v54, 0.0  ;;  %v164_v61 = vmax.f32 %v148_v55, 0.0  ;;  %v149_v62 = vadd.f32 %v429_v18, %v126_v56  ;;  %v134_v63 = vmul.f32 %v119_v14, %v114_v22 }
  0x29   :  { %v171_v0 = vmax.f32 %v155_v57, 0.0  ;;  %v172_v1 = vmax.f32 %v156_v58, 0.0  ;;  %v150_v2 = vadd.f32 %v429_v18, %v127_v59  ;;  %v135_v3 = vmul.f32 %v119_v14, %v115_v23 }
  0x2a   :  { %v177_v4 = vpack.c.bf16 %v164_v61, %v163_v60  ;;  %v165_v5 = vmax.f32 %v149_v62, 0.0  ;;  %v157_v6 = vadd.f32 %v429_v18, %v134_v63 }
  0x2b   :  { %v181_v7 = vpack.c.bf16 %v172_v1, %v171_v0  ;;  %v166_v8 = vmax.f32 %v150_v2, 0.0  ;;  %v158_v9 = vadd.f32 %v429_v18, %v135_v3 }
  0x2c   :  { %592 = vmatprep.mubr.bf16.mxu0 %v177_v4  ;;  %v173_v10 = vmax.f32 %v157_v6, 0.0 }
  0x2d   :  { %600 = vmatprep.mubr.bf16.mxu1 %v181_v7  ;;  %v178_v11 = vpack.c.bf16 %v166_v8, %v165_v5  ;;  %v174_v12 = vmax.f32 %v158_v9, 0.0 }
  0x2f   :  { %593 = vmatmul.mubr.bf16.gmra.mrb[4].mxu0 %v178_v11  ;;  %v182_v15 = vpack.c.bf16 %v174_v12, %v173_v10 }
  0x31   :  { %601 = vmatmul.mubr.bf16.gmra.mrb[4].mxu1 %v182_v15 }
  0xfa   :  { %v590_v16 = vpop.f32.mrb[0].mxu0 }
  0xfb   :  { %v598_v17 = vpop.f32.mrb[0].mxu1  ;;  %v281_v20 = vpop.f32.mrb[1].mxu0 }
  0xfc   :  { %v313_v21 = vpop.f32.mrb[1].mxu1  ;;  %v591_v22 = vpop.f32.mrb[2].mxu0 }
  0xfd   :  { %v599_v14 = vpop.f32.mrb[2].mxu1  ;;  %v510_v23 = vpack.c.bf16 %v591_v22, %v590_v16  ;;  %v284_v25 = vpop.f32.mrb[3].mxu0 }
  0xfe   :  { %v530_v24 = vpack.c.bf16 %v599_v14, %v598_v17  ;;  %v316_v26 = vpop.f32.mrb[3].mxu1  ;;  %v505_v27 = vpack.c.bf16 %v284_v25, %v281_v20 }
  0xff   :  { %v525_v18 = vpack.c.bf16 %v316_v26, %v313_v21  ;;  %549 = vst [vmem:[%s765_s6 + $0x8] sm:$0xff] %v510_v23  }
 0x100   :  { %553 = vst [vmem:[%s765_s6 + $0x28] sm:$0xff] %v530_v24   ;;  %506 = vst [vmem:[%s765_s6] sm:$0xff] %v505_v27  }
 0x101   :  { %552 = vst [vmem:[%s765_s6 + $0x20] sm:$0xff] %v525_v18  }
 0x102   :  { %v594_v28 = vpop.f32.mrb[4].mxu0 }
 0x103   :  { %v297_v29 = vpop.f32.mrb[5].mxu0 }
 0x104   :  { %v602_v30 = vpop.f32.mrb[4].mxu1  ;;  %v595_v13 = vpop.f32.mrb[6].mxu0 }
 0x105   :  { %v329_v19 = vpop.f32.mrb[5].mxu1  ;;  %v520_v31 = vpack.c.bf16 %v595_v13, %v594_v28  ;;  %v300_v32 = vpop.f32.mrb[7].mxu0 }
 0x106   :  { %v603_v33 = vpop.f32.mrb[6].mxu1  ;;  %v515_v34 = vpack.c.bf16 %v300_v32, %v297_v29 }
 0x107   :  { %551 = vst [vmem:[%s765_s6 + $0x18] sm:$0xff] %v520_v31   ;;  %v540_v35 = vpack.c.bf16 %v603_v33, %v602_v30  ;;  %v332_v36 = vpop.f32.mrb[7].mxu1 }
 0x108   :  { %550 = vst [vmem:[%s765_s6 + $0x10] sm:$0xff] %v515_v34   ;;  %v535_v37 = vpack.c.bf16 %v332_v36, %v329_v19 }
 0x109   :  { %555 = vst [vmem:[%s765_s6 + $0x38] sm:$0xff] %v540_v35  }
 0x10a   :  { %554 = vst [vmem:[%s765_s6 + $0x30] sm:$0xff] %v535_v37  }

// kernel: graph_convolutional_network_forward.7
= control target key start
LH: loop header
LB: loop body
LE: loop exit
PB: predicated region body
PF: predicated region fallthrough
CT: control target
= control target key end

     0   :  { %v808_v0 = vmov 0.0   ;;  %s939_s0 = inlined_call_operand.<no memory space> [shape: s32[1,1], index: 0, kind: input, shape index: {}]   ;;  %s940_s1 = inlined_call_operand.<no memory space> [shape: s32[1], index: 1, kind: input, shape index: {}]   ;;  %s941_s3 = inlined_call_operand.vmem [shape: bf16[128,128], index: 3, kind: input, shape index: {}]   ;;  %s942_s4 = inlined_call_operand.vmem [shape: f32[1,128], index: 4, kind: input, shape index: {}]   ;;  %s943_s5 = inlined_call_operand.vmem [shape: bf16[128,128], index: 5, kind: output, shape index: {0}]   ;;  %s944_s6 = inlined_call_operand.vmem [shape: f32[8,128], index: 6, kind: output, shape index: {1}]   ;;  %s945_s2 = inlined_call_operand.vmem [shape: bf16[128,128], index: 2, kind: input, shape index: {}]  }
   0x1   :  { %12 = sst [smem:[#allocation4]] %s939_s0  ;;  %p44_p0 = scmp.lt.s32.totalorder %s939_s0, 0  ;;  %57 = vst [vmem:[#allocation2] sm:$0xff] %v808_v0  ;;  %58 = vst [vmem:[#allocation2 + $0x8] sm:$0xff] %v808_v0 }
   0x2   :  { %59 = vst [vmem:[#allocation2 + $0x10] sm:$0xff] %v808_v0  ;;  %60 = vst [vmem:[#allocation2 + $0x18] sm:$0xff] %v808_v0  ;;  %p628_p1 = scmp.le.s32.totalorder %s940_s1, 0 }
   0x3   :  { %61 = vst [vmem:[#allocation2 + $0x20] sm:$0xff] %v808_v0  ;;  %62 = vst [vmem:[#allocation2 + $0x28] sm:$0xff] %v808_v0  ;;  %s947_s0 = smov (!%p44_p0, %s939_s0), 0  ;;  %s81_s11 = sld [smem:[#allocation4]] (!%p628_p1) }
   0x4   :  { %63 = vst [vmem:[#allocation2 + $0x30] sm:$0xff] %v808_v0  ;;  %64 = vst [vmem:[#allocation2 + $0x38] sm:$0xff] %v808_v0  ;;  %s626_s29 = sshll.u32 %s947_s0, 2  ;;  %77 = sbr.rel (%p628_p1) target bundleno = 272 (0x110), region = 21 }
   0x5   :  { %65 = vst [vmem:[#allocation2 + $0x40] sm:$0xff] %v808_v0  ;;  %66 = vst [vmem:[#allocation2 + $0x48] sm:$0xff] %v808_v0  ;;  %s876_s8 = scalar_lea.vmem %s945_s2, %s626_s29 }
   0x6   :  { %67 = vst [vmem:[#allocation2 + $0x50] sm:$0xff] %v808_v0  ;;  %68 = vst [vmem:[#allocation2 + $0x58] sm:$0xff] %v808_v0  ;;  %v800_v1 = vld [vmem:[%s876_s8] sm:$0xff] (!%p628_p1)   ;;  %v802_v11 = vld [vmem:[%s876_s8 + $0x8] sm:$0xff] (!%p628_p1)  }
   0x7   :  { %69 = vst [vmem:[#allocation2 + $0x60] sm:$0xff] %v808_v0  ;;  %70 = vst [vmem:[#allocation2 + $0x68] sm:$0xff] %v808_v0  ;;  %v801_v2 = vld [vmem:[%s876_s8 + $0x20] sm:$0xff] (!%p628_p1)   ;;  %759 = vmatprep.mubr.bf16.mxu0 (!%p628_p1), %v800_v1  ;;  %v803_v12 = vld [vmem:[%s876_s8 + $0x28] sm:$0xff] (!%p628_p1)  }
   0x8   :  { %71 = vst [vmem:[#allocation2 + $0x70] sm:$0xff] %v808_v0  ;;  %72 = vst [vmem:[#allocation2 + $0x78] sm:$0xff] %v808_v0  ;;  %767 = vmatprep.mubr.bf16.mxu1 (!%p628_p1), %v801_v2  ;;  %v804_v13 = vld [vmem:[%s876_s8 + $0x10] sm:$0xff] (!%p628_p1)   ;;  %v806_v15 = vld [vmem:[%s876_s8 + $0x18] sm:$0xff] (!%p628_p1)  }
   0x9   :  { %s629_s12 = sshll.u32 (!%p628_p1), %s81_s11, 7  ;;  %v805_v14 = vld [vmem:[%s876_s8 + $0x30] sm:$0xff] (!%p628_p1)   ;;  %v807_v16 = vld [vmem:[%s876_s8 + $0x38] sm:$0xff] (!%p628_p1)   ;;  %v103_v19 = vld [vmem:[#allocation2] sm:$0xff] (!%p628_p1) }
   0xa   :  { %s83_s13 = sshra.s32 (!%p628_p1), %s629_s12, 3  ;;  %v105_v17 = vld [vmem:[#allocation2 + $0x10] sm:$0xff] (!%p628_p1)  ;;  %v106_v23 = vld [vmem:[#allocation2 + $0x18] sm:$0xff] (!%p628_p1)  ;;  %v104_v29 = vld [vmem:[#allocation2 + $0x8] sm:$0xff] (!%p628_p1) }
   0xb   :  { %s630_s0 = sshll.u32 %s83_s13, 2  ;;  %v109_v41 = vld [vmem:[#allocation2 + $0x30] sm:$0xff]  ;;  %v107_v43 = vld [vmem:[#allocation2 + $0x20] sm:$0xff]  ;;  %v110_v47 = vld [vmem:[#allocation2 + $0x38] sm:$0xff] }
   0xc   :  { %s886_s2 = scalar_lea.vmem %s941_s3, %s630_s0  ;;  %v111_v20 = vld [vmem:[#allocation2 + $0x40] sm:$0xff]  ;;  %v112_v30 = vld [vmem:[#allocation2 + $0x48] sm:$0xff] }
   0xd   :  { %v792_v3 = vld [vmem:[%s886_s2] sm:$0xff]   ;;  %v793_v4 = vld [vmem:[%s886_s2 + $0x8] sm:$0xff]   ;;  %v794_v5 = vld [vmem:[%s886_s2 + $0x10] sm:$0xff]  }
   0xe   :  { %743 = vmatprep.subr.bf16.mxu0 %v792_v3  ;;  %775 = vmatprep.subr.bf16.mxu1 %v792_v3  ;;  %v795_v6 = vld [vmem:[%s886_s2 + $0x18] sm:$0xff]   ;;  %v796_v7 = vld [vmem:[%s886_s2 + $0x20] sm:$0xff]   ;;  %v797_v8 = vld [vmem:[%s886_s2 + $0x28] sm:$0xff]  }
   0xf   :  { %744 = vmatpush3.bf16.msra.mxu0 %v792_v3  ;;  %783 = vmatpush3.bf16.msra.mxu1 %v792_v3  ;;  %v798_v9 = vld [vmem:[%s886_s2 + $0x30] sm:$0xff]   ;;  %v799_v10 = vld [vmem:[%s886_s2 + $0x38] sm:$0xff]   ;;  %v115_v44 = vld [vmem:[#allocation2 + $0x60] sm:$0xff] }
  0x10   :  { %745 = vmatprep.subr.bf16.mxu0 %v793_v4  ;;  %776 = vmatprep.subr.bf16.mxu1 %v793_v4  ;;  %v113_v18 = vld [vmem:[#allocation2 + $0x50] sm:$0xff]  ;;  %v114_v24 = vld [vmem:[#allocation2 + $0x58] sm:$0xff]  ;;  %v108_v53 = vld [vmem:[#allocation2 + $0x28] sm:$0xff] }
  0x11   :  { %v117_v42 = vld [vmem:[#allocation2 + $0x70] sm:$0xff]  ;;  %v118_v48 = vld [vmem:[#allocation2 + $0x78] sm:$0xff]  ;;  %v116_v54 = vld [vmem:[#allocation2 + $0x68] sm:$0xff] }
  0x13   :  { %746 = vmatpush3.bf16.msra.mxu0 %v793_v4  ;;  %784 = vmatpush3.bf16.msra.mxu1 %v793_v4 }
  0x14   :  { %747 = vmatprep.subr.bf16.mxu0 %v794_v5  ;;  %777 = vmatprep.subr.bf16.mxu1 %v794_v5 }
  0x17   :  { %748 = vmatpush3.bf16.msra.mxu0 %v794_v5  ;;  %785 = vmatpush3.bf16.msra.mxu1 %v794_v5 }
  0x18   :  { %749 = vmatprep.subr.bf16.mxu0 %v795_v6  ;;  %778 = vmatprep.subr.bf16.mxu1 %v795_v6 }
  0x1b   :  { %750 = vmatpush3.bf16.msra.mxu0 %v795_v6  ;;  %786 = vmatpush3.bf16.msra.mxu1 %v795_v6 }
  0x1c   :  { %751 = vmatprep.subr.bf16.mxu0 %v796_v7  ;;  %779 = vmatprep.subr.bf16.mxu1 %v796_v7 }
  0x1f   :  { %752 = vmatpush3.bf16.msra.mxu0 %v796_v7  ;;  %787 = vmatpush3.bf16.msra.mxu1 %v796_v7 }
  0x20   :  { %753 = vmatprep.subr.bf16.mxu0 %v797_v8  ;;  %780 = vmatprep.subr.bf16.mxu1 %v797_v8 }
  0x23   :  { %754 = vmatpush3.bf16.msra.mxu0 %v797_v8  ;;  %788 = vmatpush3.bf16.msra.mxu1 %v797_v8 }
  0x24   :  { %755 = vmatprep.subr.bf16.mxu0 %v798_v9  ;;  %781 = vmatprep.subr.bf16.mxu1 %v798_v9 }
  0x27   :  { %756 = vmatpush3.bf16.msra.mxu0 %v798_v9  ;;  %789 = vmatpush3.bf16.msra.mxu1 %v798_v9 }
  0x28   :  { %757 = vmatprep.subr.bf16.mxu0 %v799_v10  ;;  %782 = vmatprep.subr.bf16.mxu1 %v799_v10 }
  0x2b   :  { %758 = vmatpush3.bf16.msra.mxu0 %v799_v10  ;;  %790 = vmatpush3.bf16.msra.mxu1 %v799_v10 }
  0x2e   :  { %760 = vmatmul.mubr.bf16.vlgmr.msra.gmra.mrb[0].mxu0 %v802_v11  ;;  %768 = vmatmul.mubr.bf16.vlgmr.msra.gmra.mrb[0].mxu1 %v803_v12 }
  0x2f   :  { %763 = vmatprep.mubr.bf16.mxu0 %v804_v13  ;;  %771 = vmatprep.mubr.bf16.mxu1 %v805_v14 }
  0x36   :  { %764 = vmatmul.mubr.bf16.gmra.mrb[4].mxu0 %v806_v15  ;;  %772 = vmatmul.mubr.bf16.gmra.mrb[4].mxu1 %v807_v16 }
 0x101   :  { %v761_v21 = vpop.f32.mrb[0].mxu0  ;;  %v769_v22 = vpop.f32.mrb[0].mxu1 }
 0x102   :  { %v330_v25 = vadd.f32 %v761_v21, %v105_v17  ;;  %v338_v26 = vadd.f32 %v769_v22, %v113_v18  ;;  %v265_v27 = vpop.f32.mrb[1].mxu0  ;;  %v297_v28 = vpop.f32.mrb[1].mxu1 }
 0x103   :  { %v328_v31 = vadd.f32 %v265_v27, %v103_v19  ;;  %v336_v32 = vadd.f32 %v297_v28, %v111_v20  ;;  %v762_v33 = vpop.f32.mrb[2].mxu0  ;;  %v770_v34 = vpop.f32.mrb[2].mxu1 }
 0x104   :  { %346 = vst [vmem:[#allocation2 + $0x10] sm:$0xff] %v330_v25  ;;  %354 = vst [vmem:[#allocation2 + $0x50] sm:$0xff] %v338_v26  ;;  %v331_v35 = vadd.f32 %v762_v33, %v106_v23  ;;  %v339_v36 = vadd.f32 %v770_v34, %v114_v24  ;;  %v268_v37 = vpop.f32.mrb[3].mxu0  ;;  %v300_v38 = vpop.f32.mrb[3].mxu1 }
 0x105   :  { %344 = vst [vmem:[#allocation2] sm:$0xff] %v328_v31  ;;  %352 = vst [vmem:[#allocation2 + $0x40] sm:$0xff] %v336_v32  ;;  %v329_v39 = vadd.f32 %v268_v37, %v104_v29  ;;  %v337_v40 = vadd.f32 %v300_v38, %v112_v30 }
 0x106   :  { %347 = vst [vmem:[#allocation2 + $0x18] sm:$0xff] %v331_v35  ;;  %355 = vst [vmem:[#allocation2 + $0x58] sm:$0xff] %v339_v36 }
 0x107   :  { %345 = vst [vmem:[#allocation2 + $0x8] sm:$0xff] %v329_v39  ;;  %353 = vst [vmem:[#allocation2 + $0x48] sm:$0xff] %v337_v40 }
 0x109   :  { %v765_v45 = vpop.f32.mrb[4].mxu0  ;;  %v773_v46 = vpop.f32.mrb[4].mxu1 }
 0x10a   :  { %v334_v49 = vadd.f32 %v765_v45, %v109_v41  ;;  %v342_v50 = vadd.f32 %v773_v46, %v117_v42  ;;  %v281_v51 = vpop.f32.mrb[5].mxu0  ;;  %v313_v52 = vpop.f32.mrb[5].mxu1 }
 0x10b   :  { %v332_v55 = vadd.f32 %v281_v51, %v107_v43  ;;  %v340_v56 = vadd.f32 %v313_v52, %v115_v44  ;;  %v766_v57 = vpop.f32.mrb[6].mxu0  ;;  %v774_v58 = vpop.f32.mrb[6].mxu1 }
 0x10c   :  { %350 = vst [vmem:[#allocation2 + $0x30] sm:$0xff] %v334_v49  ;;  %358 = vst [vmem:[#allocation2 + $0x70] sm:$0xff] %v342_v50  ;;  %v335_v59 = vadd.f32 %v766_v57, %v110_v47  ;;  %v343_v60 = vadd.f32 %v774_v58, %v118_v48  ;;  %v284_v61 = vpop.f32.mrb[7].mxu0  ;;  %v316_v62 = vpop.f32.mrb[7].mxu1 }
 0x10d   :  { %348 = vst [vmem:[#allocation2 + $0x20] sm:$0xff] %v332_v55  ;;  %356 = vst [vmem:[#allocation2 + $0x60] sm:$0xff] %v340_v56  ;;  %v333_v63 = vadd.f32 %v284_v61, %v108_v53  ;;  %v341_v1 = vadd.f32 %v316_v62, %v116_v54 }
 0x10e   :  { %351 = vst [vmem:[#allocation2 + $0x38] sm:$0xff] %v335_v59  ;;  %359 = vst [vmem:[#allocation2 + $0x78] sm:$0xff] %v343_v60 }
 0x10f   :  { %349 = vst [vmem:[#allocation2 + $0x28] sm:$0xff] %v333_v63  ;;  %357 = vst [vmem:[#allocation2 + $0x68] sm:$0xff] %v341_v1 }
 0x110 PF:  { %549 = vst [vmem:[%s944_s6] sm:$0xff] %v808_v0  ;;  %v363_v2 = vld [vmem:[#allocation2] sm:$0xff]  ;;  %v364_v3 = vld [vmem:[#allocation2 + $0x8] sm:$0xff]  ;;  %v365_v7 = vld [vmem:[#allocation2 + $0x10] sm:$0xff] }
 0x111   :  { %v647_v4 = vld [vmem:[%s942_s4] ss:$0 sm:$0xff]  ;;  %v366_v8 = vld [vmem:[#allocation2 + $0x18] sm:$0xff]  ;;  %v372_v20 = vld [vmem:[#allocation2 + $0x48] sm:$0xff] }
 0x112   :  { %v386_v5 = vadd.f32 %v647_v4, %v363_v2  ;;  %v387_v6 = vadd.f32 %v647_v4, %v364_v3  ;;  %v388_v10 = vadd.f32 %v647_v4, %v365_v7  ;;  %v389_v11 = vadd.f32 %v647_v4, %v366_v8  ;;  %v371_v19 = vld [vmem:[#allocation2 + $0x40] sm:$0xff]  ;;  %v373_v21 = vld [vmem:[#allocation2 + $0x50] sm:$0xff]  ;;  %v374_v26 = vld [vmem:[#allocation2 + $0x58] sm:$0xff] }
 0x113   :  { %v369_v14 = vld [vmem:[#allocation2 + $0x30] sm:$0xff]  ;;  %v394_v25 = vadd.f32 %v647_v4, %v371_v19  ;;  %v395_v30 = vadd.f32 %v647_v4, %v372_v20  ;;  %v396_v31 = vadd.f32 %v647_v4, %v373_v21  ;;  %v397_v32 = vadd.f32 %v647_v4, %v374_v26 }
 0x114   :  { %v367_v9 = vld [vmem:[#allocation2 + $0x20] sm:$0xff]  ;;  %v683_v16 = vpack.c.bf16 %v387_v6, %v386_v5  ;;  %v572_v17 = vmul.f32 %v386_v5, %v386_v5  ;;  %v573_v0 = vmul.f32 %v387_v6, %v387_v6  ;;  %v688_v22 = vpack.c.bf16 %v389_v11, %v388_v10  ;;  %v377_v33 = vld [vmem:[#allocation2 + $0x70] sm:$0xff] }
 0x115   :  { %v390_v13 = vadd.f32 %v647_v4, %v367_v9  ;;  %v370_v15 = vld [vmem:[#allocation2 + $0x38] sm:$0xff]  ;;  %v392_v23 = vadd.f32 %v647_v4, %v369_v14  ;;  %v375_v27 = vld [vmem:[#allocation2 + $0x60] sm:$0xff]  ;;  %v400_v38 = vadd.f32 %v647_v4, %v377_v33  ;;  %v703_v39 = vpack.c.bf16 %v395_v30, %v394_v25 }
 0x116   :  { %v368_v12 = vld [vmem:[#allocation2 + $0x28] sm:$0xff]  ;;  %v393_v24 = vadd.f32 %v647_v4, %v370_v15  ;;  %684 = vst [vmem:[%s943_s5] sm:$0xff] %v683_v16   ;;  %v378_v34 = vld [vmem:[#allocation2 + $0x78] sm:$0xff]  ;;  %720 = vst [vmem:[%s943_s5 + $0x8] sm:$0xff] %v688_v22   ;;  %v398_v36 = vadd.f32 %v647_v4, %v375_v27  ;;  %v708_v40 = vpack.c.bf16 %v397_v32, %v396_v31 }
 0x117   :  { %v391_v18 = vadd.f32 %v647_v4, %v368_v12  ;;  %v376_v28 = vld [vmem:[#allocation2 + $0x68] sm:$0xff]  ;;  %v401_v41 = vadd.f32 %v647_v4, %v378_v34  ;;  %v550_v42 = vadd.f32 %v387_v6, %v386_v5  ;;  %v588_v44 = vadd.f32 %v573_v0, %v572_v17  ;;  %723 = vst [vmem:[%s943_s5 + $0x20] sm:$0xff] %v703_v39  }
 0x118   :  { %v698_v35 = vpack.c.bf16 %v393_v24, %v392_v23  ;;  %v399_v37 = vadd.f32 %v647_v4, %v376_v28  ;;  %724 = vst [vmem:[%s943_s5 + $0x28] sm:$0xff] %v708_v40  }
 0x119   :  { %v693_v29 = vpack.c.bf16 %v391_v18, %v390_v13  ;;  %v718_v45 = vpack.c.bf16 %v401_v41, %v400_v38  ;;  %v565_v46 = vrot.slane %v550_v42, 4  ;;  %v603_v47 = vrot.slane %v588_v44, 4 }
 0x11a   :  { %722 = vst [vmem:[%s943_s5 + $0x18] sm:$0xff] %v698_v35   ;;  %v713_v43 = vpack.c.bf16 %v399_v37, %v398_v36 }
 0x11b   :  { %721 = vst [vmem:[%s943_s5 + $0x10] sm:$0xff] %v693_v29   ;;  %726 = vst [vmem:[%s943_s5 + $0x38] sm:$0xff] %v718_v45   ;;  %v566_v48 = vadd.f32 %v565_v46, %v550_v42  ;;  %v604_v49 = vadd.f32 %v603_v47, %v588_v44 }
 0x11c   :  { %725 = vst [vmem:[%s943_s5 + $0x30] sm:$0xff] %v713_v43  }
 0x11d   :  { %v567_v50 = vrot.slane %v566_v48, 2  ;;  %v605_v51 = vrot.slane %v604_v49, 2 }
 0x11f   :  { %v568_v52 = vadd.f32 %v567_v50, %v566_v48  ;;  %v606_v53 = vadd.f32 %v605_v51, %v604_v49 }
 0x121   :  { %v569_v54 = vrot.slane %v568_v52, 1  ;;  %v607_v55 = vrot.slane %v606_v53, 1 }
 0x123   :  { %v570_v56 = vadd.f32 %v569_v54, %v568_v52  ;;  %v608_v57 = vadd.f32 %v607_v55, %v606_v53 }
 0x125   :  { %571 = vst [vmem:[%s944_s6] sm:$0x1] %v570_v56  ;;  %609 = vst [vmem:[%s944_s6 + $0x1] sm:$0x1] %v608_v57 }

// kernel: graph_convolutional_network_forward.11
= control target key start
LH: loop header
LB: loop body
LE: loop exit
PB: predicated region body
PF: predicated region fallthrough
CT: control target
= control target key end

     0   :  { %v531_v0 = vmov 0.0   ;;  %s655_s0 = inlined_call_operand.<no memory space> [shape: s32[1,1], index: 0, kind: input, shape index: {}]   ;;  %s656_s1 = inlined_call_operand.<no memory space> [shape: s32[1], index: 1, kind: input, shape index: {}]   ;;  %s657_s3 = inlined_call_operand.vmem [shape: bf16[128,128], index: 3, kind: input, shape index: {}]   ;;  %s658_s4 = inlined_call_operand.vmem [shape: f32[1,128], index: 4, kind: input, shape index: {}]   ;;  %s659_s5 = inlined_call_operand.vmem [shape: f32[128,128], index: 5, kind: output, shape index: {}]   ;;  %s660_s2 = inlined_call_operand.vmem [shape: bf16[128,128], index: 2, kind: input, shape index: {}]  }
   0x1   :  { %10 = sst [smem:[#allocation4]] %s655_s0  ;;  %p42_p0 = scmp.lt.s32.totalorder %s655_s0, 0  ;;  %55 = vst [vmem:[#allocation2] sm:$0xff] %v531_v0  ;;  %56 = vst [vmem:[#allocation2 + $0x8] sm:$0xff] %v531_v0 }
   0x2   :  { %57 = vst [vmem:[#allocation2 + $0x10] sm:$0xff] %v531_v0  ;;  %58 = vst [vmem:[#allocation2 + $0x18] sm:$0xff] %v531_v0  ;;  %p430_p1 = scmp.le.s32.totalorder %s656_s1, 0 }
   0x3   :  { %59 = vst [vmem:[#allocation2 + $0x20] sm:$0xff] %v531_v0  ;;  %60 = vst [vmem:[#allocation2 + $0x28] sm:$0xff] %v531_v0  ;;  %s662_s0 = smov (!%p42_p0, %s655_s0), 0  ;;  %s79_s7 = sld [smem:[#allocation4]] (!%p430_p1) }
   0x4   :  { %61 = vst [vmem:[#allocation2 + $0x30] sm:$0xff] %v531_v0  ;;  %62 = vst [vmem:[#allocation2 + $0x38] sm:$0xff] %v531_v0  ;;  %s428_s26 = sshll.u32 %s662_s0, 2  ;;  %75 = sbr.rel (%p430_p1) target bundleno = 272 (0x110), region = 21 }
   0x5   :  { %63 = vst [vmem:[#allocation2 + $0x40] sm:$0xff] %v531_v0  ;;  %64 = vst [vmem:[#allocation2 + $0x48] sm:$0xff] %v531_v0  ;;  %s578_s29 = scalar_lea.vmem %s660_s2, %s428_s26 }
   0x6   :  { %65 = vst [vmem:[#allocation2 + $0x50] sm:$0xff] %v531_v0  ;;  %66 = vst [vmem:[#allocation2 + $0x58] sm:$0xff] %v531_v0  ;;  %v523_v1 = vld [vmem:[%s578_s29] sm:$0xff] (!%p430_p1)   ;;  %v525_v11 = vld [vmem:[%s578_s29 + $0x8] sm:$0xff] (!%p430_p1)  }
   0x7   :  { %67 = vst [vmem:[#allocation2 + $0x60] sm:$0xff] %v531_v0  ;;  %68 = vst [vmem:[#allocation2 + $0x68] sm:$0xff] %v531_v0  ;;  %v524_v2 = vld [vmem:[%s578_s29 + $0x20] sm:$0xff] (!%p430_p1)   ;;  %482 = vmatprep.mubr.bf16.mxu0 (!%p430_p1), %v523_v1  ;;  %v526_v12 = vld [vmem:[%s578_s29 + $0x28] sm:$0xff] (!%p430_p1)  }
   0x8   :  { %69 = vst [vmem:[#allocation2 + $0x70] sm:$0xff] %v531_v0  ;;  %70 = vst [vmem:[#allocation2 + $0x78] sm:$0xff] %v531_v0  ;;  %490 = vmatprep.mubr.bf16.mxu1 (!%p430_p1), %v524_v2  ;;  %v527_v13 = vld [vmem:[%s578_s29 + $0x10] sm:$0xff] (!%p430_p1)   ;;  %v529_v15 = vld [vmem:[%s578_s29 + $0x18] sm:$0xff] (!%p430_p1)  }
   0x9   :  { %s431_s8 = sshll.u32 (!%p430_p1), %s79_s7, 7  ;;  %v528_v14 = vld [vmem:[%s578_s29 + $0x30] sm:$0xff] (!%p430_p1)   ;;  %v530_v16 = vld [vmem:[%s578_s29 + $0x38] sm:$0xff] (!%p430_p1)   ;;  %v101_v19 = vld [vmem:[#allocation2] sm:$0xff] (!%p430_p1) }
   0xa   :  { %s81_s9 = sshra.s32 (!%p430_p1), %s431_s8, 3  ;;  %v103_v17 = vld [vmem:[#allocation2 + $0x10] sm:$0xff] (!%p430_p1)  ;;  %v104_v23 = vld [vmem:[#allocation2 + $0x18] sm:$0xff] (!%p430_p1)  ;;  %v102_v29 = vld [vmem:[#allocation2 + $0x8] sm:$0xff] (!%p430_p1) }
   0xb   :  { %s432_s0 = sshll.u32 %s81_s9, 2  ;;  %v107_v41 = vld [vmem:[#allocation2 + $0x30] sm:$0xff]  ;;  %v105_v43 = vld [vmem:[#allocation2 + $0x20] sm:$0xff]  ;;  %v108_v47 = vld [vmem:[#allocation2 + $0x38] sm:$0xff] }
   0xc   :  { %s588_s2 = scalar_lea.vmem %s657_s3, %s432_s0  ;;  %v109_v20 = vld [vmem:[#allocation2 + $0x40] sm:$0xff]  ;;  %v110_v30 = vld [vmem:[#allocation2 + $0x48] sm:$0xff] }
   0xd   :  { %v515_v3 = vld [vmem:[%s588_s2] sm:$0xff]   ;;  %v516_v4 = vld [vmem:[%s588_s2 + $0x8] sm:$0xff]   ;;  %v517_v5 = vld [vmem:[%s588_s2 + $0x10] sm:$0xff]  }
   0xe   :  { %466 = vmatprep.subr.bf16.mxu0 %v515_v3  ;;  %498 = vmatprep.subr.bf16.mxu1 %v515_v3  ;;  %v518_v6 = vld [vmem:[%s588_s2 + $0x18] sm:$0xff]   ;;  %v519_v7 = vld [vmem:[%s588_s2 + $0x20] sm:$0xff]   ;;  %v520_v8 = vld [vmem:[%s588_s2 + $0x28] sm:$0xff]  }
   0xf   :  { %467 = vmatpush3.bf16.msra.mxu0 %v515_v3  ;;  %506 = vmatpush3.bf16.msra.mxu1 %v515_v3  ;;  %v521_v9 = vld [vmem:[%s588_s2 + $0x30] sm:$0xff]   ;;  %v522_v10 = vld [vmem:[%s588_s2 + $0x38] sm:$0xff]   ;;  %v113_v44 = vld [vmem:[#allocation2 + $0x60] sm:$0xff] }
  0x10   :  { %468 = vmatprep.subr.bf16.mxu0 %v516_v4  ;;  %499 = vmatprep.subr.bf16.mxu1 %v516_v4  ;;  %v111_v18 = vld [vmem:[#allocation2 + $0x50] sm:$0xff]  ;;  %v112_v24 = vld [vmem:[#allocation2 + $0x58] sm:$0xff]  ;;  %v106_v53 = vld [vmem:[#allocation2 + $0x28] sm:$0xff] }
  0x11   :  { %v115_v42 = vld [vmem:[#allocation2 + $0x70] sm:$0xff]  ;;  %v116_v48 = vld [vmem:[#allocation2 + $0x78] sm:$0xff]  ;;  %v114_v54 = vld [vmem:[#allocation2 + $0x68] sm:$0xff] }
  0x13   :  { %469 = vmatpush3.bf16.msra.mxu0 %v516_v4  ;;  %507 = vmatpush3.bf16.msra.mxu1 %v516_v4 }
  0x14   :  { %470 = vmatprep.subr.bf16.mxu0 %v517_v5  ;;  %500 = vmatprep.subr.bf16.mxu1 %v517_v5 }
  0x17   :  { %471 = vmatpush3.bf16.msra.mxu0 %v517_v5  ;;  %508 = vmatpush3.bf16.msra.mxu1 %v517_v5 }
  0x18   :  { %472 = vmatprep.subr.bf16.mxu0 %v518_v6  ;;  %501 = vmatprep.subr.bf16.mxu1 %v518_v6 }
  0x1b   :  { %473 = vmatpush3.bf16.msra.mxu0 %v518_v6  ;;  %509 = vmatpush3.bf16.msra.mxu1 %v518_v6 }
  0x1c   :  { %474 = vmatprep.subr.bf16.mxu0 %v519_v7  ;;  %502 = vmatprep.subr.bf16.mxu1 %v519_v7 }
  0x1f   :  { %475 = vmatpush3.bf16.msra.mxu0 %v519_v7  ;;  %510 = vmatpush3.bf16.msra.mxu1 %v519_v7 }
  0x20   :  { %476 = vmatprep.subr.bf16.mxu0 %v520_v8  ;;  %503 = vmatprep.subr.bf16.mxu1 %v520_v8 }
  0x23   :  { %477 = vmatpush3.bf16.msra.mxu0 %v520_v8  ;;  %511 = vmatpush3.bf16.msra.mxu1 %v520_v8 }
  0x24   :  { %478 = vmatprep.subr.bf16.mxu0 %v521_v9  ;;  %504 = vmatprep.subr.bf16.mxu1 %v521_v9 }
  0x27   :  { %479 = vmatpush3.bf16.msra.mxu0 %v521_v9  ;;  %512 = vmatpush3.bf16.msra.mxu1 %v521_v9 }
  0x28   :  { %480 = vmatprep.subr.bf16.mxu0 %v522_v10  ;;  %505 = vmatprep.subr.bf16.mxu1 %v522_v10 }
  0x2b   :  { %481 = vmatpush3.bf16.msra.mxu0 %v522_v10  ;;  %513 = vmatpush3.bf16.msra.mxu1 %v522_v10 }
  0x2e   :  { %483 = vmatmul.mubr.bf16.vlgmr.msra.gmra.mrb[0].mxu0 %v525_v11  ;;  %491 = vmatmul.mubr.bf16.vlgmr.msra.gmra.mrb[0].mxu1 %v526_v12 }
  0x2f   :  { %486 = vmatprep.mubr.bf16.mxu0 %v527_v13  ;;  %494 = vmatprep.mubr.bf16.mxu1 %v528_v14 }
  0x36   :  { %487 = vmatmul.mubr.bf16.gmra.mrb[4].mxu0 %v529_v15  ;;  %495 = vmatmul.mubr.bf16.gmra.mrb[4].mxu1 %v530_v16 }
 0x101   :  { %v484_v21 = vpop.f32.mrb[0].mxu0  ;;  %v492_v22 = vpop.f32.mrb[0].mxu1 }
 0x102   :  { %v328_v25 = vadd.f32 %v484_v21, %v103_v17  ;;  %v336_v26 = vadd.f32 %v492_v22, %v111_v18  ;;  %v263_v27 = vpop.f32.mrb[1].mxu0  ;;  %v295_v28 = vpop.f32.mrb[1].mxu1 }
 0x103   :  { %v326_v31 = vadd.f32 %v263_v27, %v101_v19  ;;  %v334_v32 = vadd.f32 %v295_v28, %v109_v20  ;;  %v485_v33 = vpop.f32.mrb[2].mxu0  ;;  %v493_v34 = vpop.f32.mrb[2].mxu1 }
 0x104   :  { %344 = vst [vmem:[#allocation2 + $0x10] sm:$0xff] %v328_v25  ;;  %352 = vst [vmem:[#allocation2 + $0x50] sm:$0xff] %v336_v26  ;;  %v329_v35 = vadd.f32 %v485_v33, %v104_v23  ;;  %v337_v36 = vadd.f32 %v493_v34, %v112_v24  ;;  %v266_v37 = vpop.f32.mrb[3].mxu0  ;;  %v298_v38 = vpop.f32.mrb[3].mxu1 }
 0x105   :  { %342 = vst [vmem:[#allocation2] sm:$0xff] %v326_v31  ;;  %350 = vst [vmem:[#allocation2 + $0x40] sm:$0xff] %v334_v32  ;;  %v327_v39 = vadd.f32 %v266_v37, %v102_v29  ;;  %v335_v40 = vadd.f32 %v298_v38, %v110_v30 }
 0x106   :  { %345 = vst [vmem:[#allocation2 + $0x18] sm:$0xff] %v329_v35  ;;  %353 = vst [vmem:[#allocation2 + $0x58] sm:$0xff] %v337_v36 }
 0x107   :  { %343 = vst [vmem:[#allocation2 + $0x8] sm:$0xff] %v327_v39  ;;  %351 = vst [vmem:[#allocation2 + $0x48] sm:$0xff] %v335_v40 }
 0x109   :  { %v488_v45 = vpop.f32.mrb[4].mxu0  ;;  %v496_v46 = vpop.f32.mrb[4].mxu1 }
 0x10a   :  { %v332_v49 = vadd.f32 %v488_v45, %v107_v41  ;;  %v340_v50 = vadd.f32 %v496_v46, %v115_v42  ;;  %v279_v51 = vpop.f32.mrb[5].mxu0  ;;  %v311_v52 = vpop.f32.mrb[5].mxu1 }
 0x10b   :  { %v330_v55 = vadd.f32 %v279_v51, %v105_v43  ;;  %v338_v56 = vadd.f32 %v311_v52, %v113_v44  ;;  %v489_v57 = vpop.f32.mrb[6].mxu0  ;;  %v497_v58 = vpop.f32.mrb[6].mxu1 }
 0x10c   :  { %348 = vst [vmem:[#allocation2 + $0x30] sm:$0xff] %v332_v49  ;;  %356 = vst [vmem:[#allocation2 + $0x70] sm:$0xff] %v340_v50  ;;  %v333_v59 = vadd.f32 %v489_v57, %v108_v47  ;;  %v341_v60 = vadd.f32 %v497_v58, %v116_v48  ;;  %v282_v61 = vpop.f32.mrb[7].mxu0  ;;  %v314_v62 = vpop.f32.mrb[7].mxu1 }
 0x10d   :  { %346 = vst [vmem:[#allocation2 + $0x20] sm:$0xff] %v330_v55  ;;  %354 = vst [vmem:[#allocation2 + $0x60] sm:$0xff] %v338_v56  ;;  %v331_v63 = vadd.f32 %v282_v61, %v106_v53  ;;  %v339_v0 = vadd.f32 %v314_v62, %v114_v54 }
 0x10e   :  { %349 = vst [vmem:[#allocation2 + $0x38] sm:$0xff] %v333_v59  ;;  %357 = vst [vmem:[#allocation2 + $0x78] sm:$0xff] %v341_v60 }
 0x10f   :  { %347 = vst [vmem:[#allocation2 + $0x28] sm:$0xff] %v331_v63  ;;  %355 = vst [vmem:[#allocation2 + $0x68] sm:$0xff] %v339_v0 }
 0x110 PF:  { %v361_v1 = vld [vmem:[#allocation2] sm:$0xff]  ;;  %v362_v3 = vld [vmem:[#allocation2 + $0x8] sm:$0xff]  ;;  %v363_v6 = vld [vmem:[#allocation2 + $0x10] sm:$0xff] }
 0x111   :  { %v449_v2 = vld [vmem:[%s658_s4] ss:$0 sm:$0xff]  ;;  %v364_v7 = vld [vmem:[#allocation2 + $0x18] sm:$0xff]  ;;  %v370_v19 = vld [vmem:[#allocation2 + $0x48] sm:$0xff] }
 0x112   :  { %v384_v4 = vadd.f32 %v449_v2, %v361_v1  ;;  %v385_v5 = vadd.f32 %v449_v2, %v362_v3  ;;  %v386_v9 = vadd.f32 %v449_v2, %v363_v6  ;;  %v387_v10 = vadd.f32 %v449_v2, %v364_v7  ;;  %v369_v18 = vld [vmem:[#allocation2 + $0x40] sm:$0xff]  ;;  %v371_v20 = vld [vmem:[#allocation2 + $0x50] sm:$0xff]  ;;  %v372_v24 = vld [vmem:[#allocation2 + $0x58] sm:$0xff] }
 0x113   :  { %v367_v13 = vld [vmem:[#allocation2 + $0x30] sm:$0xff]  ;;  %v392_v21 = vadd.f32 %v449_v2, %v369_v18  ;;  %v393_v22 = vadd.f32 %v449_v2, %v370_v19  ;;  %v394_v23 = vadd.f32 %v449_v2, %v371_v20  ;;  %v395_v27 = vadd.f32 %v449_v2, %v372_v24 }
 0x114   :  { %v365_v8 = vld [vmem:[#allocation2 + $0x20] sm:$0xff]  ;;  %400 = vst [vmem:[%s659_s5] sm:$0xff] %v384_v4  ;;  %401 = vst [vmem:[%s659_s5 + $0x8] sm:$0xff] %v385_v5  ;;  %v390_v16 = vadd.f32 %v449_v2, %v367_v13  ;;  %v375_v30 = vld [vmem:[#allocation2 + $0x70] sm:$0xff] }
 0x115   :  { %v388_v11 = vadd.f32 %v449_v2, %v365_v8  ;;  %v368_v14 = vld [vmem:[#allocation2 + $0x38] sm:$0xff]  ;;  %402 = vst [vmem:[%s659_s5 + $0x10] sm:$0xff] %v386_v9  ;;  %403 = vst [vmem:[%s659_s5 + $0x18] sm:$0xff] %v387_v10  ;;  %v373_v25 = vld [vmem:[#allocation2 + $0x60] sm:$0xff]  ;;  %v398_v32 = vadd.f32 %v449_v2, %v375_v30 }
 0x116   :  { %v366_v12 = vld [vmem:[#allocation2 + $0x28] sm:$0xff]  ;;  %v391_v17 = vadd.f32 %v449_v2, %v368_v14  ;;  %406 = vst [vmem:[%s659_s5 + $0x30] sm:$0xff] %v390_v16  ;;  %v396_v28 = vadd.f32 %v449_v2, %v373_v25  ;;  %v376_v31 = vld [vmem:[#allocation2 + $0x78] sm:$0xff]  ;;  %408 = vst [vmem:[%s659_s5 + $0x40] sm:$0xff] %v392_v21 }
 0x117   :  { %v389_v15 = vadd.f32 %v449_v2, %v366_v12  ;;  %404 = vst [vmem:[%s659_s5 + $0x20] sm:$0xff] %v388_v11  ;;  %v374_v26 = vld [vmem:[#allocation2 + $0x68] sm:$0xff]  ;;  %409 = vst [vmem:[%s659_s5 + $0x48] sm:$0xff] %v393_v22  ;;  %v399_v33 = vadd.f32 %v449_v2, %v376_v31 }
 0x118   :  { %407 = vst [vmem:[%s659_s5 + $0x38] sm:$0xff] %v391_v17  ;;  %v397_v29 = vadd.f32 %v449_v2, %v374_v26  ;;  %410 = vst [vmem:[%s659_s5 + $0x50] sm:$0xff] %v394_v23 }
 0x119   :  { %405 = vst [vmem:[%s659_s5 + $0x28] sm:$0xff] %v389_v15  ;;  %411 = vst [vmem:[%s659_s5 + $0x58] sm:$0xff] %v395_v27 }
 0x11a   :  { %412 = vst [vmem:[%s659_s5 + $0x60] sm:$0xff] %v396_v28  ;;  %413 = vst [vmem:[%s659_s5 + $0x68] sm:$0xff] %v397_v29 }
 0x11b   :  { %414 = vst [vmem:[%s659_s5 + $0x70] sm:$0xff] %v398_v32  ;;  %415 = vst [vmem:[%s659_s5 + $0x78] sm:$0xff] %v399_v33 }

</bundles_post_ra>
